<compile_context>
chip_gen: v7x
topology: tpu7x:2x2x1
jax: 0.10.0
libtpu: 0.0.40
codegen_flags: <defaults>
</compile_context>

<pallas_src>
from functools import partial

import jax
import jax.numpy as jnp
from jax.experimental import pallas as pl
from jax.experimental.pallas import tpu as pltpu


def _flash_mha_kernel(xq_ref, xkv_ref, wq_ref, bq_ref, wk_ref, bk_ref,
                      wv_ref, bv_ref, wp_ref, bp_ref, o_ref,
                      q_sc, k_sc, v_sc, m_sc, l_sc, acc_sc, out_sc,
                      *, num_heads, head_dim):
    qi = pl.program_id(1)
    kvi = pl.program_id(2)
    nkv = pl.num_programs(2)

    # ---- K/V projection: once per batch element (first q-tile only), per kv
    # tile.  Cached head-major in persistent VMEM scratch, reused by every
    # later q-tile of the same batch element.
    @pl.when(qi == 0)
    def _fill_kv_cache():
        xkv = xkv_ref[0]                                            # (tkv, C) bf16
        k_full = (jnp.dot(xkv, wk_ref[...], preferred_element_type=jnp.float32)
                  + bk_ref[...]).astype(jnp.bfloat16)               # one downcast
        v_full = (jnp.dot(xkv, wv_ref[...], preferred_element_type=jnp.float32)
                  + bv_ref[...]).astype(jnp.bfloat16)
        # TODO(synk): convert to lax.fori_loop(unroll=2..4) if num_heads is large.
        for h in range(num_heads):                                  # static: H small
            lo = h * head_dim
            k_sc[kvi, h] = k_full[:, lo:lo + head_dim]
            v_sc[kvi, h] = v_full[:, lo:lo + head_dim]

    # ---- Q projection + online-softmax state init: once per q-tile.
    @pl.when(kvi == 0)
    def _start_q_tile():
        xq = xq_ref[0]                                              # (tq, C) bf16
        q_full = (jnp.dot(xq, wq_ref[...], preferred_element_type=jnp.float32)
                  + bq_ref[...]).astype(jnp.bfloat16)               # scale pre-folded
        for h in range(num_heads):
            lo = h * head_dim
            q_sc[h] = q_full[:, lo:lo + head_dim]
        m_sc[...] = jnp.full_like(m_sc, -jnp.inf)
        l_sc[...] = jnp.zeros_like(l_sc)
        acc_sc[...] = jnp.zeros_like(acc_sc)

    # ---- Flash online-softmax update for this (q-tile, kv-tile) pair.
    q_t = q_sc[...]                                                 # (H, tq, hd) bf16
    k_t = k_sc[kvi]                                                 # (H, tkv, hd) bf16
    v_t = v_sc[kvi]                                                 # (H, tkv, hd) bf16
    s = jnp.einsum('hqd,hkd->hqk', q_t, k_t,
                   preferred_element_type=jnp.float32)              # (H, tq, tkv) f32
    m_prev = m_sc[...]
    m_new = jnp.maximum(m_prev, jnp.max(s, axis=-1, keepdims=True))
    alpha = jnp.exp(m_prev - m_new)
    p = jnp.exp(s - m_new)
    l_sc[...] = alpha * l_sc[...] + jnp.sum(p, axis=-1, keepdims=True)
    pv = jnp.einsum('hqk,hkd->hqd', p.astype(jnp.bfloat16), v_t,
                    preferred_element_type=jnp.float32)
    acc_sc[...] = alpha * acc_sc[...] + pv
    m_sc[...] = m_new

    # ---- Finalize: normalize, stage concat-heads, single output projection.
    @pl.when(kvi == nkv - 1)
    def _finalize():
        inv_l = pl.reciprocal(l_sc[...], approx=True)               # EUP slot
        normed = (acc_sc[...] * inv_l).astype(jnp.bfloat16)         # (H, tq, hd)
        for h in range(num_heads):
            lo = h * head_dim
            out_sc[:, lo:lo + head_dim] = normed[h]                 # concat layout
        out = jnp.dot(out_sc[...], wp_ref[...],
                      preferred_element_type=jnp.float32) + bp_ref[...]
        # TODO(synk): emit bf16 (out_shape + store) if downstream accepts it,
        # halving output HBM writeback.
        o_ref[0] = out.astype(o_ref.dtype)


def _pick_tile(n, target):
    """Largest multiple of 16 dividing n and <= target; falls back to n."""
    best = n
    for t in range(16, min(n, target) + 1, 16):
        if n % t == 0:
            best = t
    return best


def attention_pallas(x, w_qkv, b_qkv, w_proj, b_proj, num_heads,
                     qk_scale=None, tq=None, tkv=None):
    """x: (B, N, C). w_qkv: (3C, C) (PyTorch Linear layout), b_qkv: (3C,).
       w_proj: (C, C), b_proj: (C,)."""
    B, N, C = x.shape
    H = num_heads
    hd = C // H
    assert H * hd == C
    scale = qk_scale if qk_scale is not None else hd ** (-0.5)

    # Tile sizes: on v6e/v7x prefer 256-multiples (2x256x256 MXU); 128-multiples
    # are enough on v5e.  Tiles must divide N exactly (no ragged-tile masking).
    if tq is None:
        tq = _pick_tile(N, 256)
    if tkv is None:
        tkv = _pick_tile(N, 512)
    assert N % tq == 0 and N % tkv == 0, "tq/tkv must divide N"
    nq, nkv = N // tq, N // tkv

    # --- host-side weight repackaging (PyTorch Linear: y = x @ W.T + b) ---
    wqkv_t = jnp.transpose(w_qkv).astype(jnp.float32)               # (C, 3C)
    wq = (wqkv_t[:, :C] * scale).astype(jnp.bfloat16)               # scale folded in
    wk = wqkv_t[:, C:2 * C].astype(jnp.bfloat16)
    wv = wqkv_t[:, 2 * C:].astype(jnp.bfloat16)
    bq = (b_qkv[:C].astype(jnp.float32) * scale).reshape(1, C)
    bk = b_qkv[C:2 * C].astype(jnp.float32).reshape(1, C)
    bv = b_qkv[2 * C:].astype(jnp.float32).reshape(1, C)
    wp = jnp.transpose(w_proj).astype(jnp.bfloat16)                 # (C, C)
    bp = b_proj.astype(jnp.float32).reshape(1, C)
    x_bf16 = x.astype(jnp.bfloat16)

    kernel = partial(_flash_mha_kernel, num_heads=H, head_dim=hd)
    const = lambda b, qi, ki: (0, 0)

    return pl.pallas_call(
        kernel,
        out_shape=jax.ShapeDtypeStruct((B, N, C), jnp.float32),
        grid_spec=pltpu.PrefetchScalarGridSpec(
            num_scalar_prefetch=0,
            grid=(B, nq, nkv),
            in_specs=[
                pl.BlockSpec((1, tq, C), lambda b, qi, ki: (b, qi, 0)),   # x q-rows
                pl.BlockSpec((1, tkv, C), lambda b, qi, ki: (b, ki, 0)),  # x kv-rows
                # Weights/biases: constant index maps -> VMEM-resident, no re-DMA.
                # TODO(synk): pipeline_mode=pl.Buffered(1) here to drop the unused
                # second pipeline buffer once single-buffering is verified.
                pl.BlockSpec((C, C), const), pl.BlockSpec((1, C), const),  # Wq, bq
                pl.BlockSpec((C, C), const), pl.BlockSpec((1, C), const),  # Wk, bk
                pl.BlockSpec((C, C), const), pl.BlockSpec((1, C), const),  # Wv, bv
                pl.BlockSpec((C, C), const), pl.BlockSpec((1, C), const),  # Wp, bp
            ],
            out_specs=pl.BlockSpec((1, tq, C), lambda b, qi, ki: (b, qi, 0)),
            scratch_shapes=[
                pltpu.VMEM((H, tq, hd), jnp.bfloat16),         # Q tile (head-major)
                pltpu.VMEM((nkv, H, tkv, hd), jnp.bfloat16),   # K cache (whole seq)
                pltpu.VMEM((nkv, H, tkv, hd), jnp.bfloat16),   # V cache (whole seq)
                pltpu.VMEM((H, tq, 1), jnp.float32),           # m (running max)
                pltpu.VMEM((H, tq, 1), jnp.float32),           # l (running denom)
                pltpu.VMEM((H, tq, hd), jnp.float32),          # output accumulator
                pltpu.VMEM((tq, C), jnp.bfloat16),             # concat-heads staging
            ],
        ),
        compiler_params=pltpu.CompilerParams(
            # b is parallel (megacore); kv axis is the softmax reduction -> arbitrary.
            # TODO(synk): making the q-tile axis "parallel" would help v7x at B==1,
            # but breaks the once-per-batch K/V cache fill (would require per-q-tile
            # K/V recompute); revisit if B is routinely 1 on v7x.
            dimension_semantics=("parallel", "arbitrary", "arbitrary"),
            vmem_limit_bytes=64 * 1024 * 1024,
        ),
    )(x_bf16, x_bf16, wq, bq, wk, bk, wv, bv, wp, bp)


def attention_reference(x, w_qkv, b_qkv, w_proj, b_proj, num_heads, qk_scale=None):
    """Plain-JAX reference reproducing the PyTorch forward exactly (f32)."""
    B, N, C = x.shape
    H = num_heads
    hd = C // H
    scale = qk_scale if qk_scale is not None else hd ** (-0.5)
    qkv = x @ w_qkv.T + b_qkv                                   # (B, N, 3C)
    qkv = qkv.reshape(B, N, 3, H, hd).transpose(2, 0, 3, 1, 4)  # (3, B, H, N, hd)
    q, k, v = qkv[0], qkv[1], qkv[2]
    attn = jnp.einsum('bhnd,bhmd->bhnm', q, k) * scale
    attn = jax.nn.softmax(attn, axis=-1)
    out = jnp.einsum('bhnm,bhmd->bhnd', attn, v)
    out = out.transpose(0, 2, 1, 3).reshape(B, N, C)
    return out @ w_proj.T + b_proj


if __name__ == "__main__":
    # Small deterministic config: B=2, N=16 tokens, C=32 channels, 4 heads.
    B, N, C, H = 2, 16, 32, 4

    key = jax.random.PRNGKey(0)
    kx, k1, k2, k3, k4 = jax.random.split(key, 5)
    x = jax.random.normal(kx, (B, N, C), dtype=jnp.float32)
    w_qkv = 0.05 * jax.random.normal(k1, (3 * C, C), dtype=jnp.float32)
    b_qkv = 0.05 * jax.random.normal(k2, (3 * C,), dtype=jnp.float32)
    w_proj = 0.05 * jax.random.normal(k3, (C, C), dtype=jnp.float32)
    b_proj = 0.05 * jax.random.normal(k4, (C,), dtype=jnp.float32)

    # tq=tkv=8 -> grid (B, 2, 2): exercises the online softmax across kv tiles
    # and the K/V-cache reuse across q tiles even at this tiny smoke-test shape.
    out = attention_pallas(x, w_qkv, b_qkv, w_proj, b_proj, num_heads=H, tq=8, tkv=8)
    out = jax.block_until_ready(out)

    ref = attention_reference(x, w_qkv, b_qkv, w_proj, b_proj, num_heads=H)
    assert out.shape == (B, N, C)
    # bf16 matmul operands (f32 accumulation / f32 softmax) -> slightly relaxed tol.
    assert jnp.allclose(out, ref, atol=1e-2, rtol=2e-2), "mismatch vs reference"

    print("KERNEL_OK")
</pallas_src>

<mosaic_0001>
module attributes {stable_mosaic.version = 11 : i64} {
  func.func @_flash_mha_kernel(%arg0: i32, %arg1: i32, %arg2: i32, %arg3: memref<1x8x32xbf16, #tpu.memory_space<vmem>>, %arg4: memref<1x8x32xbf16, #tpu.memory_space<vmem>>, %arg5: memref<32x32xbf16, #tpu.memory_space<vmem>>, %arg6: memref<1x32xf32, #tpu.memory_space<vmem>>, %arg7: memref<32x32xbf16, #tpu.memory_space<vmem>>, %arg8: memref<1x32xf32, #tpu.memory_space<vmem>>, %arg9: memref<32x32xbf16, #tpu.memory_space<vmem>>, %arg10: memref<1x32xf32, #tpu.memory_space<vmem>>, %arg11: memref<32x32xbf16, #tpu.memory_space<vmem>>, %arg12: memref<1x32xf32, #tpu.memory_space<vmem>>, %arg13: memref<1x8x32xf32, #tpu.memory_space<vmem>>, %arg14: memref<4x8x8xbf16, #tpu.memory_space<vmem>>, %arg15: memref<2x4x8x8xbf16, #tpu.memory_space<vmem>>, %arg16: memref<2x4x8x8xbf16, #tpu.memory_space<vmem>>, %arg17: memref<4x8x1xf32, #tpu.memory_space<vmem>>, %arg18: memref<4x8x1xf32, #tpu.memory_space<vmem>>, %arg19: memref<4x8x8xf32, #tpu.memory_space<vmem>>, %arg20: memref<8x32xbf16, #tpu.memory_space<vmem>>) attributes {dimension_semantics = [#tpu.dimension_semantics<parallel>, #tpu.dimension_semantics<arbitrary>, #tpu.dimension_semantics<arbitrary>], iteration_bounds = array<i64: 2, 2, 2>, scalar_prefetch = 0 : i64, scratch_operands = 7 : i64, tpu.core_type = #tpu.core_type<tc>, window_params = [{transform_indices = @transform_0, window_bounds = array<i64: 1, 8, 32>}, {transform_indices = @transform_1, window_bounds = array<i64: 1, 8, 32>}, {pipeline_mode = #tpu.pipeline_mode<synchronous>, transform_indices = @transform_2, window_bounds = array<i64: 32, 32>}, {pipeline_mode = #tpu.pipeline_mode<synchronous>, transform_indices = @transform_3, window_bounds = array<i64: 1, 32>}, {pipeline_mode = #tpu.pipeline_mode<synchronous>, transform_indices = @transform_4, window_bounds = array<i64: 32, 32>}, {pipeline_mode = #tpu.pipeline_mode<synchronous>, transform_indices = @transform_5, window_bounds = array<i64: 1, 32>}, {pipeline_mode = #tpu.pipeline_mode<synchronous>, transform_indices = @transform_6, window_bounds = array<i64: 32, 32>}, {pipeline_mode = #tpu.pipeline_mode<synchronous>, transform_indices = @transform_7, window_bounds = array<i64: 1, 32>}, {pipeline_mode = #tpu.pipeline_mode<synchronous>, transform_indices = @transform_8, window_bounds = array<i64: 32, 32>}, {pipeline_mode = #tpu.pipeline_mode<synchronous>, transform_indices = @transform_9, window_bounds = array<i64: 1, 32>}, {transform_indices = @transform_10, window_bounds = array<i64: 1, 8, 32>}]} {
    %c0_i32 = arith.constant 0 : i32
    %0 = arith.cmpi eq, %arg1, %c0_i32 : i32
    %1 = arith.extui %0 : i1 to i32
    %c0_i32_0 = arith.constant 0 : i32
    %2 = arith.cmpi ne, %1, %c0_i32_0 : i32
    scf.if %2 {
      %c0_33 = arith.constant 0 : index
      %c0_34 = arith.constant 0 : index
      %c0_35 = arith.constant 0 : index
      %40 = vector.load %arg4[%c0_33, %c0_34, %c0_35] : memref<1x8x32xbf16, #tpu.memory_space<vmem>>, vector<1x8x32xbf16>
      %41 = vector.shape_cast %40 : vector<1x8x32xbf16> to vector<8x32xbf16>
      %c0_36 = arith.constant 0 : index
      %c0_37 = arith.constant 0 : index
      %42 = vector.load %arg7[%c0_36, %c0_37] : memref<32x32xbf16, #tpu.memory_space<vmem>>, vector<32x32xbf16>
      %cst_38 = arith.constant dense<0.000000e+00> : vector<8x32xf32>
      %43 = tpu.matmul %41, %42, %cst_38 {dimension_numbers = #tpu.dot_dimension_numbers<[1], [0], [0], [1], [0, 0, 1, 1], [], []>} : vector<8x32xbf16>, vector<32x32xbf16>, vector<8x32xf32> -> vector<8x32xf32>
      %c0_39 = arith.constant 0 : index
      %c0_40 = arith.constant 0 : index
      %44 = vector.load %arg8[%c0_39, %c0_40] : memref<1x32xf32, #tpu.memory_space<vmem>>, vector<1x32xf32>
      %45 = vector.broadcast %44 : vector<1x32xf32> to vector<8x32xf32>
      %46 = arith.addf %43, %45 : vector<8x32xf32>
      %47 = arith.truncf %46 : vector<8x32xf32> to vector<8x32xbf16>
      %c0_41 = arith.constant 0 : index
      %c0_42 = arith.constant 0 : index
      %48 = vector.load %arg9[%c0_41, %c0_42] : memref<32x32xbf16, #tpu.memory_space<vmem>>, vector<32x32xbf16>
      %cst_43 = arith.constant dense<0.000000e+00> : vector<8x32xf32>
      %49 = tpu.matmul %41, %48, %cst_43 {dimension_numbers = #tpu.dot_dimension_numbers<[1], [0], [0], [1], [0, 0, 1, 1], [], []>} : vector<8x32xbf16>, vector<32x32xbf16>, vector<8x32xf32> -> vector<8x32xf32>
      %c0_44 = arith.constant 0 : index
      %c0_45 = arith.constant 0 : index
      %50 = vector.load %arg10[%c0_44, %c0_45] : memref<1x32xf32, #tpu.memory_space<vmem>>, vector<1x32xf32>
      %51 = vector.broadcast %50 : vector<1x32xf32> to vector<8x32xf32>
      %52 = arith.addf %49, %51 : vector<8x32xf32>
      %53 = arith.truncf %52 : vector<8x32xf32> to vector<8x32xbf16>
      %54 = vector.extract_strided_slice %47 {offsets = [0, 0], sizes = [8, 8], strides = [1, 1]} : vector<8x32xbf16> to vector<8x8xbf16>
      %55 = arith.index_cast %arg2 : i32 to index
      %c0_46 = arith.constant 0 : index
      %c0_47 = arith.constant 0 : index
      %c0_48 = arith.constant 0 : index
      %56 = vector.load %arg15[%55, %c0_46, %c0_47, %c0_48] : memref<2x4x8x8xbf16, #tpu.memory_space<vmem>>, vector<1x1x8x8xbf16>
      %57 = vector.shape_cast %56 : vector<1x1x8x8xbf16> to vector<8x8xbf16>
      %58 = vector.shape_cast %54 : vector<8x8xbf16> to vector<1x1x8x8xbf16>
      tpu.vector_store %arg15[%55, %c0_46, %c0_47, %c0_48], %58 {strides = array<i32>} : memref<2x4x8x8xbf16, #tpu.memory_space<vmem>>, vector<1x1x8x8xbf16>,
      %59 = vector.extract_strided_slice %53 {offsets = [0, 0], sizes = [8, 8], strides = [1, 1]} : vector<8x32xbf16> to vector<8x8xbf16>
      %60 = arith.index_cast %arg2 : i32 to index
      %c0_49 = arith.constant 0 : index
      %c0_50 = arith.constant 0 : index
      %c0_51 = arith.constant 0 : index
      %61 = vector.load %arg16[%60, %c0_49, %c0_50, %c0_51] : memref<2x4x8x8xbf16, #tpu.memory_space<vmem>>, vector<1x1x8x8xbf16>
      %62 = vector.shape_cast %61 : vector<1x1x8x8xbf16> to vector<8x8xbf16>
      %63 = vector.shape_cast %59 : vector<8x8xbf16> to vector<1x1x8x8xbf16>
      tpu.vector_store %arg16[%60, %c0_49, %c0_50, %c0_51], %63 {strides = array<i32>} : memref<2x4x8x8xbf16, #tpu.memory_space<vmem>>, vector<1x1x8x8xbf16>,
      %64 = vector.extract_strided_slice %47 {offsets = [0, 8], sizes = [8, 8], strides = [1, 1]} : vector<8x32xbf16> to vector<8x8xbf16>
      %65 = arith.index_cast %arg2 : i32 to index
      %c1 = arith.constant 1 : index
      %c0_52 = arith.constant 0 : index
      %c0_53 = arith.constant 0 : index
      %66 = vector.load %arg15[%65, %c1, %c0_52, %c0_53] : memref<2x4x8x8xbf16, #tpu.memory_space<vmem>>, vector<1x1x8x8xbf16>
      %67 = vector.shape_cast %66 : vector<1x1x8x8xbf16> to vector<8x8xbf16>
      %68 = vector.shape_cast %64 : vector<8x8xbf16> to vector<1x1x8x8xbf16>
      tpu.vector_store %arg15[%65, %c1, %c0_52, %c0_53], %68 {strides = array<i32>} : memref<2x4x8x8xbf16, #tpu.memory_space<vmem>>, vector<1x1x8x8xbf16>,
      %69 = vector.extract_strided_slice %53 {offsets = [0, 8], sizes = [8, 8], strides = [1, 1]} : vector<8x32xbf16> to vector<8x8xbf16>
      %70 = arith.index_cast %arg2 : i32 to index
      %c1_54 = arith.constant 1 : index
      %c0_55 = arith.constant 0 : index
      %c0_56 = arith.constant 0 : index
      %71 = vector.load %arg16[%70, %c1_54, %c0_55, %c0_56] : memref<2x4x8x8xbf16, #tpu.memory_space<vmem>>, vector<1x1x8x8xbf16>
      %72 = vector.shape_cast %71 : vector<1x1x8x8xbf16> to vector<8x8xbf16>
      %73 = vector.shape_cast %69 : vector<8x8xbf16> to vector<1x1x8x8xbf16>
      tpu.vector_store %arg16[%70, %c1_54, %c0_55, %c0_56], %73 {strides = array<i32>} : memref<2x4x8x8xbf16, #tpu.memory_space<vmem>>, vector<1x1x8x8xbf16>,
      %74 = vector.extract_strided_slice %47 {offsets = [0, 16], sizes = [8, 8], strides = [1, 1]} : vector<8x32xbf16> to vector<8x8xbf16>
      %75 = arith.index_cast %arg2 : i32 to index
      %c2 = arith.constant 2 : index
      %c0_57 = arith.constant 0 : index
      %c0_58 = arith.constant 0 : index
      %76 = vector.load %arg15[%75, %c2, %c0_57, %c0_58] : memref<2x4x8x8xbf16, #tpu.memory_space<vmem>>, vector<1x1x8x8xbf16>
      %77 = vector.shape_cast %76 : vector<1x1x8x8xbf16> to vector<8x8xbf16>
      %78 = vector.shape_cast %74 : vector<8x8xbf16> to vector<1x1x8x8xbf16>
      tpu.vector_store %arg15[%75, %c2, %c0_57, %c0_58], %78 {strides = array<i32>} : memref<2x4x8x8xbf16, #tpu.memory_space<vmem>>, vector<1x1x8x8xbf16>,
      %79 = vector.extract_strided_slice %53 {offsets = [0, 16], sizes = [8, 8], strides = [1, 1]} : vector<8x32xbf16> to vector<8x8xbf16>
      %80 = arith.index_cast %arg2 : i32 to index
      %c2_59 = arith.constant 2 : index
      %c0_60 = arith.constant 0 : index
      %c0_61 = arith.constant 0 : index
      %81 = vector.load %arg16[%80, %c2_59, %c0_60, %c0_61] : memref<2x4x8x8xbf16, #tpu.memory_space<vmem>>, vector<1x1x8x8xbf16>
      %82 = vector.shape_cast %81 : vector<1x1x8x8xbf16> to vector<8x8xbf16>
      %83 = vector.shape_cast %79 : vector<8x8xbf16> to vector<1x1x8x8xbf16>
      tpu.vector_store %arg16[%80, %c2_59, %c0_60, %c0_61], %83 {strides = array<i32>} : memref<2x4x8x8xbf16, #tpu.memory_space<vmem>>, vector<1x1x8x8xbf16>,
      %84 = vector.extract_strided_slice %47 {offsets = [0, 24], sizes = [8, 8], strides = [1, 1]} : vector<8x32xbf16> to vector<8x8xbf16>
      %85 = arith.index_cast %arg2 : i32 to index
      %c3 = arith.constant 3 : index
      %c0_62 = arith.constant 0 : index
      %c0_63 = arith.constant 0 : index
      %86 = vector.load %arg15[%85, %c3, %c0_62, %c0_63] : memref<2x4x8x8xbf16, #tpu.memory_space<vmem>>, vector<1x1x8x8xbf16>
      %87 = vector.shape_cast %86 : vector<1x1x8x8xbf16> to vector<8x8xbf16>
      %88 = vector.shape_cast %84 : vector<8x8xbf16> to vector<1x1x8x8xbf16>
      tpu.vector_store %arg15[%85, %c3, %c0_62, %c0_63], %88 {strides = array<i32>} : memref<2x4x8x8xbf16, #tpu.memory_space<vmem>>, vector<1x1x8x8xbf16>,
      %89 = vector.extract_strided_slice %53 {offsets = [0, 24], sizes = [8, 8], strides = [1, 1]} : vector<8x32xbf16> to vector<8x8xbf16>
      %90 = arith.index_cast %arg2 : i32 to index
      %c3_64 = arith.constant 3 : index
      %c0_65 = arith.constant 0 : index
      %c0_66 = arith.constant 0 : index
      %91 = vector.load %arg16[%90, %c3_64, %c0_65, %c0_66] : memref<2x4x8x8xbf16, #tpu.memory_space<vmem>>, vector<1x1x8x8xbf16>
      %92 = vector.shape_cast %91 : vector<1x1x8x8xbf16> to vector<8x8xbf16>
      %93 = vector.shape_cast %89 : vector<8x8xbf16> to vector<1x1x8x8xbf16>
      tpu.vector_store %arg16[%90, %c3_64, %c0_65, %c0_66], %93 {strides = array<i32>} : memref<2x4x8x8xbf16, #tpu.memory_space<vmem>>, vector<1x1x8x8xbf16>,
    } else {
    }
    %c0_i32_1 = arith.constant 0 : i32
    %3 = arith.cmpi eq, %arg2, %c0_i32_1 : i32
    %4 = arith.extui %3 : i1 to i32
    %c0_i32_2 = arith.constant 0 : i32
    %5 = arith.cmpi ne, %4, %c0_i32_2 : i32
    scf.if %5 {
      %c0_33 = arith.constant 0 : index
      %c0_34 = arith.constant 0 : index
      %c0_35 = arith.constant 0 : index
      %40 = vector.load %arg3[%c0_33, %c0_34, %c0_35] : memref<1x8x32xbf16, #tpu.memory_space<vmem>>, vector<1x8x32xbf16>
      %41 = vector.shape_cast %40 : vector<1x8x32xbf16> to vector<8x32xbf16>
      %c0_36 = arith.constant 0 : index
      %c0_37 = arith.constant 0 : index
      %42 = vector.load %arg5[%c0_36, %c0_37] : memref<32x32xbf16, #tpu.memory_space<vmem>>, vector<32x32xbf16>
      %cst_38 = arith.constant dense<0.000000e+00> : vector<8x32xf32>
      %43 = tpu.matmul %41, %42, %cst_38 {dimension_numbers = #tpu.dot_dimension_numbers<[1], [0], [0], [1], [0, 0, 1, 1], [], []>} : vector<8x32xbf16>, vector<32x32xbf16>, vector<8x32xf32> -> vector<8x32xf32>
      %c0_39 = arith.constant 0 : index
      %c0_40 = arith.constant 0 : index
      %44 = vector.load %arg6[%c0_39, %c0_40] : memref<1x32xf32, #tpu.memory_space<vmem>>, vector<1x32xf32>
      %45 = vector.broadcast %44 : vector<1x32xf32> to vector<8x32xf32>
      %46 = arith.addf %43, %45 : vector<8x32xf32>
      %47 = arith.truncf %46 : vector<8x32xf32> to vector<8x32xbf16>
      %48 = vector.extract_strided_slice %47 {offsets = [0, 0], sizes = [8, 8], strides = [1, 1]} : vector<8x32xbf16> to vector<8x8xbf16>
      %c0_41 = arith.constant 0 : index
      %c0_42 = arith.constant 0 : index
      %c0_43 = arith.constant 0 : index
      %49 = vector.load %arg14[%c0_41, %c0_42, %c0_43] : memref<4x8x8xbf16, #tpu.memory_space<vmem>>, vector<1x8x8xbf16>
      %50 = vector.shape_cast %49 : vector<1x8x8xbf16> to vector<8x8xbf16>
      %51 = vector.shape_cast %48 : vector<8x8xbf16> to vector<1x8x8xbf16>
      tpu.vector_store %arg14[%c0_41, %c0_42, %c0_43], %51 {strides = array<i32>} : memref<4x8x8xbf16, #tpu.memory_space<vmem>>, vector<1x8x8xbf16>,
      %52 = vector.extract_strided_slice %47 {offsets = [0, 8], sizes = [8, 8], strides = [1, 1]} : vector<8x32xbf16> to vector<8x8xbf16>
      %c1 = arith.constant 1 : index
      %c0_44 = arith.constant 0 : index
      %c0_45 = arith.constant 0 : index
      %53 = vector.load %arg14[%c1, %c0_44, %c0_45] : memref<4x8x8xbf16, #tpu.memory_space<vmem>>, vector<1x8x8xbf16>
      %54 = vector.shape_cast %53 : vector<1x8x8xbf16> to vector<8x8xbf16>
      %55 = vector.shape_cast %52 : vector<8x8xbf16> to vector<1x8x8xbf16>
      tpu.vector_store %arg14[%c1, %c0_44, %c0_45], %55 {strides = array<i32>} : memref<4x8x8xbf16, #tpu.memory_space<vmem>>, vector<1x8x8xbf16>,
      %56 = vector.extract_strided_slice %47 {offsets = [0, 16], sizes = [8, 8], strides = [1, 1]} : vector<8x32xbf16> to vector<8x8xbf16>
      %c2 = arith.constant 2 : index
      %c0_46 = arith.constant 0 : index
      %c0_47 = arith.constant 0 : index
      %57 = vector.load %arg14[%c2, %c0_46, %c0_47] : memref<4x8x8xbf16, #tpu.memory_space<vmem>>, vector<1x8x8xbf16>
      %58 = vector.shape_cast %57 : vector<1x8x8xbf16> to vector<8x8xbf16>
      %59 = vector.shape_cast %56 : vector<8x8xbf16> to vector<1x8x8xbf16>
      tpu.vector_store %arg14[%c2, %c0_46, %c0_47], %59 {strides = array<i32>} : memref<4x8x8xbf16, #tpu.memory_space<vmem>>, vector<1x8x8xbf16>,
      %60 = vector.extract_strided_slice %47 {offsets = [0, 24], sizes = [8, 8], strides = [1, 1]} : vector<8x32xbf16> to vector<8x8xbf16>
      %c3 = arith.constant 3 : index
      %c0_48 = arith.constant 0 : index
      %c0_49 = arith.constant 0 : index
      %61 = vector.load %arg14[%c3, %c0_48, %c0_49] : memref<4x8x8xbf16, #tpu.memory_space<vmem>>, vector<1x8x8xbf16>
      %62 = vector.shape_cast %61 : vector<1x8x8xbf16> to vector<8x8xbf16>
      %63 = vector.shape_cast %60 : vector<8x8xbf16> to vector<1x8x8xbf16>
      tpu.vector_store %arg14[%c3, %c0_48, %c0_49], %63 {strides = array<i32>} : memref<4x8x8xbf16, #tpu.memory_space<vmem>>, vector<1x8x8xbf16>,
      %cst_50 = arith.constant 0xFF800000 : f32
      %64 = vector.broadcast %cst_50 : f32 to vector<4x8x1xf32>
      %c0_51 = arith.constant 0 : index
      %c0_52 = arith.constant 0 : index
      %c0_53 = arith.constant 0 : index
      %65 = vector.load %arg17[%c0_51, %c0_52, %c0_53] : memref<4x8x1xf32, #tpu.memory_space<vmem>>, vector<4x8x1xf32>
      tpu.vector_store %arg17[%c0_51, %c0_52, %c0_53], %64 {strides = array<i32>} : memref<4x8x1xf32, #tpu.memory_space<vmem>>, vector<4x8x1xf32>,
      %cst_54 = arith.constant 0.000000e+00 : f32
      %66 = vector.broadcast %cst_54 : f32 to vector<4x8x1xf32>
      %c0_55 = arith.constant 0 : index
      %c0_56 = arith.constant 0 : index
      %c0_57 = arith.constant 0 : index
      %67 = vector.load %arg18[%c0_55, %c0_56, %c0_57] : memref<4x8x1xf32, #tpu.memory_space<vmem>>, vector<4x8x1xf32>
      tpu.vector_store %arg18[%c0_55, %c0_56, %c0_57], %66 {strides = array<i32>} : memref<4x8x1xf32, #tpu.memory_space<vmem>>, vector<4x8x1xf32>,
      %cst_58 = arith.constant 0.000000e+00 : f32
      %68 = vector.broadcast %cst_58 : f32 to vector<4x8x8xf32>
      %c0_59 = arith.constant 0 : index
      %c0_60 = arith.constant 0 : index
      %c0_61 = arith.constant 0 : index
      %69 = vector.load %arg19[%c0_59, %c0_60, %c0_61] : memref<4x8x8xf32, #tpu.memory_space<vmem>>, vector<4x8x8xf32>
      tpu.vector_store %arg19[%c0_59, %c0_60, %c0_61], %68 {strides = array<i32>} : memref<4x8x8xf32, #tpu.memory_space<vmem>>, vector<4x8x8xf32>,
    } else {
    }
    %c0 = arith.constant 0 : index
    %c0_3 = arith.constant 0 : index
    %c0_4 = arith.constant 0 : index
    %6 = vector.load %arg14[%c0, %c0_3, %c0_4] : memref<4x8x8xbf16, #tpu.memory_space<vmem>>, vector<4x8x8xbf16>
    %7 = arith.index_cast %arg2 : i32 to index
    %c0_5 = arith.constant 0 : index
    %c0_6 = arith.constant 0 : index
    %c0_7 = arith.constant 0 : index
    %8 = vector.load %arg15[%7, %c0_5, %c0_6, %c0_7] : memref<2x4x8x8xbf16, #tpu.memory_space<vmem>>, vector<1x4x8x8xbf16>
    %9 = vector.shape_cast %8 : vector<1x4x8x8xbf16> to vector<4x8x8xbf16>
    %10 = arith.index_cast %arg2 : i32 to index
    %c0_8 = arith.constant 0 : index
    %c0_9 = arith.constant 0 : index
    %c0_10 = arith.constant 0 : index
    %11 = vector.load %arg16[%10, %c0_8, %c0_9, %c0_10] : memref<2x4x8x8xbf16, #tpu.memory_space<vmem>>, vector<1x4x8x8xbf16>
    %12 = vector.shape_cast %11 : vector<1x4x8x8xbf16> to vector<4x8x8xbf16>
    "tpu.trace_start"() <{level = 10 : i32, message = "hqd,hkd->hqk"}> : () -> ()
    %cst = arith.constant dense<0.000000e+00> : vector<4x8x8xf32>
    %13 = tpu.matmul %6, %9, %cst {dimension_numbers = #tpu.dot_dimension_numbers<[2], [2], [1], [1], [0, 0, 0, 1, 1, 1], [0], [0]>} : vector<4x8x8xbf16>, vector<4x8x8xbf16>, vector<4x8x8xf32> -> vector<4x8x8xf32>
    "tpu.trace_stop"() : () -> ()
    %c0_11 = arith.constant 0 : index
    %c0_12 = arith.constant 0 : index
    %c0_13 = arith.constant 0 : index
    %14 = vector.load %arg17[%c0_11, %c0_12, %c0_13] : memref<4x8x1xf32, #tpu.memory_space<vmem>>, vector<4x8x1xf32>
    %cst_14 = arith.constant dense<0xFF800000> : vector<4x8xf32>
    %15 = vector.multi_reduction <maximumf>, %13, %cst_14 [2] : vector<4x8x8xf32> to vector<4x8xf32>
    %16 = vector.shape_cast %15 : vector<4x8xf32> to vector<4x8x1xf32>
    %17 = arith.maximumf %14, %16 : vector<4x8x1xf32>
    %18 = arith.subf %14, %17 : vector<4x8x1xf32>
    %19 = math.exp %18 : vector<4x8x1xf32>
    %20 = vector.broadcast %17 : vector<4x8x1xf32> to vector<4x8x8xf32>
    %21 = arith.subf %13, %20 : vector<4x8x8xf32>
    %22 = math.exp %21 : vector<4x8x8xf32>
    %c0_15 = arith.constant 0 : index
    %c0_16 = arith.constant 0 : index
    %c0_17 = arith.constant 0 : index
    %23 = vector.load %arg18[%c0_15, %c0_16, %c0_17] : memref<4x8x1xf32, #tpu.memory_space<vmem>>, vector<4x8x1xf32>
    %24 = arith.mulf %19, %23 : vector<4x8x1xf32>
    %cst_18 = arith.constant dense<0.000000e+00> : vector<4x8xf32>
    %25 = vector.multi_reduction <add>, %22, %cst_18 [2] : vector<4x8x8xf32> to vector<4x8xf32>
    %26 = vector.shape_cast %25 : vector<4x8xf32> to vector<4x8x1xf32>
    %27 = arith.addf %24, %26 : vector<4x8x1xf32>
    %c0_19 = arith.constant 0 : index
    %c0_20 = arith.constant 0 : index
    %c0_21 = arith.constant 0 : index
    %28 = vector.load %arg18[%c0_19, %c0_20, %c0_21] : memref<4x8x1xf32, #tpu.memory_space<vmem>>, vector<4x8x1xf32>
    tpu.vector_store %arg18[%c0_19, %c0_20, %c0_21], %27 {strides = array<i32>} : memref<4x8x1xf32, #tpu.memory_space<vmem>>, vector<4x8x1xf32>,
    %29 = arith.truncf %22 : vector<4x8x8xf32> to vector<4x8x8xbf16>
    "tpu.trace_start"() <{level = 10 : i32, message = "hqk,hkd->hqd"}> : () -> ()
    %cst_22 = arith.constant dense<0.000000e+00> : vector<4x8x8xf32>
    %30 = tpu.matmul %29, %12, %cst_22 {dimension_numbers = #tpu.dot_dimension_numbers<[2], [1], [1], [2], [0, 0, 0, 1, 1, 2], [0], [0]>} : vector<4x8x8xbf16>, vector<4x8x8xbf16>, vector<4x8x8xf32> -> vector<4x8x8xf32>
    "tpu.trace_stop"() : () -> ()
    %c0_23 = arith.constant 0 : index
    %c0_24 = arith.constant 0 : index
    %c0_25 = arith.constant 0 : index
    %31 = vector.load %arg19[%c0_23, %c0_24, %c0_25] : memref<4x8x8xf32, #tpu.memory_space<vmem>>, vector<4x8x8xf32>
    %32 = vector.broadcast %19 : vector<4x8x1xf32> to vector<4x8x8xf32>
    %33 = arith.mulf %32, %31 : vector<4x8x8xf32>
    %34 = arith.addf %33, %30 : vector<4x8x8xf32>
    %c0_26 = arith.constant 0 : index
    %c0_27 = arith.constant 0 : index
    %c0_28 = arith.constant 0 : index
    %35 = vector.load %arg19[%c0_26, %c0_27, %c0_28] : memref<4x8x8xf32, #tpu.memory_space<vmem>>, vector<4x8x8xf32>
    tpu.vector_store %arg19[%c0_26, %c0_27, %c0_28], %34 {strides = array<i32>} : memref<4x8x8xf32, #tpu.memory_space<vmem>>, vector<4x8x8xf32>,
    %c0_29 = arith.constant 0 : index
    %c0_30 = arith.constant 0 : index
    %c0_31 = arith.constant 0 : index
    %36 = vector.load %arg17[%c0_29, %c0_30, %c0_31] : memref<4x8x1xf32, #tpu.memory_space<vmem>>, vector<4x8x1xf32>
    tpu.vector_store %arg17[%c0_29, %c0_30, %c0_31], %17 {strides = array<i32>} : memref<4x8x1xf32, #tpu.memory_space<vmem>>, vector<4x8x1xf32>,
    %c1_i32 = arith.constant 1 : i32
    %37 = arith.cmpi eq, %arg2, %c1_i32 : i32
    %38 = arith.extui %37 : i1 to i32
    %c0_i32_32 = arith.constant 0 : i32
    %39 = arith.cmpi ne, %38, %c0_i32_32 : i32
    scf.if %39 {
      %c0_33 = arith.constant 0 : index
      %c0_34 = arith.constant 0 : index
      %c0_35 = arith.constant 0 : index
      %40 = vector.load %arg18[%c0_33, %c0_34, %c0_35] : memref<4x8x1xf32, #tpu.memory_space<vmem>>, vector<4x8x1xf32>
      %41 = tpu.reciprocal %40 {approx = true} : vector<4x8x1xf32> -> vector<4x8x1xf32>
      %c0_36 = arith.constant 0 : index
      %c0_37 = arith.constant 0 : index
      %c0_38 = arith.constant 0 : index
      %42 = vector.load %arg19[%c0_36, %c0_37, %c0_38] : memref<4x8x8xf32, #tpu.memory_space<vmem>>, vector<4x8x8xf32>
      %43 = vector.broadcast %41 : vector<4x8x1xf32> to vector<4x8x8xf32>
      %44 = arith.mulf %42, %43 : vector<4x8x8xf32>
      %45 = arith.truncf %44 : vector<4x8x8xf32> to vector<4x8x8xbf16>
      %46 = vector.extract_strided_slice %45 {offsets = [0, 0, 0], sizes = [1, 8, 8], strides = [1, 1, 1]} : vector<4x8x8xbf16> to vector<1x8x8xbf16>
      %47 = vector.shape_cast %46 : vector<1x8x8xbf16> to vector<8x8xbf16>
      %c0_39 = arith.constant 0 : index
      %c0_40 = arith.constant 0 : index
      %48 = vector.load %arg20[%c0_39, %c0_40] : memref<8x32xbf16, #tpu.memory_space<vmem>>, vector<8x8xbf16>
      tpu.vector_store %arg20[%c0_39, %c0_40], %47 {strides = array<i32>} : memref<8x32xbf16, #tpu.memory_space<vmem>>, vector<8x8xbf16>,
      %49 = vector.extract_strided_slice %45 {offsets = [1, 0, 0], sizes = [1, 8, 8], strides = [1, 1, 1]} : vector<4x8x8xbf16> to vector<1x8x8xbf16>
      %50 = vector.shape_cast %49 : vector<1x8x8xbf16> to vector<8x8xbf16>
      %c0_41 = arith.constant 0 : index
      %c8 = arith.constant 8 : index
      %51 = vector.load %arg20[%c0_41, %c8] : memref<8x32xbf16, #tpu.memory_space<vmem>>, vector<8x8xbf16>
      tpu.vector_store %arg20[%c0_41, %c8], %50 {strides = array<i32>} : memref<8x32xbf16, #tpu.memory_space<vmem>>, vector<8x8xbf16>,
      %52 = vector.extract_strided_slice %45 {offsets = [2, 0, 0], sizes = [1, 8, 8], strides = [1, 1, 1]} : vector<4x8x8xbf16> to vector<1x8x8xbf16>
      %53 = vector.shape_cast %52 : vector<1x8x8xbf16> to vector<8x8xbf16>
      %c0_42 = arith.constant 0 : index
      %c16 = arith.constant 16 : index
      %54 = vector.load %arg20[%c0_42, %c16] : memref<8x32xbf16, #tpu.memory_space<vmem>>, vector<8x8xbf16>
      tpu.vector_store %arg20[%c0_42, %c16], %53 {strides = array<i32>} : memref<8x32xbf16, #tpu.memory_space<vmem>>, vector<8x8xbf16>,
      %55 = vector.extract_strided_slice %45 {offsets = [3, 0, 0], sizes = [1, 8, 8], strides = [1, 1, 1]} : vector<4x8x8xbf16> to vector<1x8x8xbf16>
      %56 = vector.shape_cast %55 : vector<1x8x8xbf16> to vector<8x8xbf16>
      %c0_43 = arith.constant 0 : index
      %c24 = arith.constant 24 : index
      %57 = vector.load %arg20[%c0_43, %c24] : memref<8x32xbf16, #tpu.memory_space<vmem>>, vector<8x8xbf16>
      tpu.vector_store %arg20[%c0_43, %c24], %56 {strides = array<i32>} : memref<8x32xbf16, #tpu.memory_space<vmem>>, vector<8x8xbf16>,
      %c0_44 = arith.constant 0 : index
      %c0_45 = arith.constant 0 : index
      %58 = vector.load %arg20[%c0_44, %c0_45] : memref<8x32xbf16, #tpu.memory_space<vmem>>, vector<8x32xbf16>
      %c0_46 = arith.constant 0 : index
      %c0_47 = arith.constant 0 : index
      %59 = vector.load %arg11[%c0_46, %c0_47] : memref<32x32xbf16, #tpu.memory_space<vmem>>, vector<32x32xbf16>
      %cst_48 = arith.constant dense<0.000000e+00> : vector<8x32xf32>
      %60 = tpu.matmul %58, %59, %cst_48 {dimension_numbers = #tpu.dot_dimension_numbers<[1], [0], [0], [1], [0, 0, 1, 1], [], []>} : vector<8x32xbf16>, vector<32x32xbf16>, vector<8x32xf32> -> vector<8x32xf32>
      %c0_49 = arith.constant 0 : index
      %c0_50 = arith.constant 0 : index
      %61 = vector.load %arg12[%c0_49, %c0_50] : memref<1x32xf32, #tpu.memory_space<vmem>>, vector<1x32xf32>
      %62 = vector.broadcast %61 : vector<1x32xf32> to vector<8x32xf32>
      %63 = arith.addf %60, %62 : vector<8x32xf32>
      %c0_51 = arith.constant 0 : index
      %c0_52 = arith.constant 0 : index
      %c0_53 = arith.constant 0 : index
      %64 = vector.load %arg13[%c0_51, %c0_52, %c0_53] : memref<1x8x32xf32, #tpu.memory_space<vmem>>, vector<1x8x32xf32>
      %65 = vector.shape_cast %64 : vector<1x8x32xf32> to vector<8x32xf32>
      %66 = vector.shape_cast %63 : vector<8x32xf32> to vector<1x8x32xf32>
      tpu.vector_store %arg13[%c0_51, %c0_52, %c0_53], %66 {strides = array<i32>} : memref<1x8x32xf32, #tpu.memory_space<vmem>>, vector<1x8x32xf32>,
    } else {
    }
    return
  }
  func.func @transform_0(%arg0: i32, %arg1: i32, %arg2: i32) -> (i32, i32, i32) {
    %c0_i32 = arith.constant 0 : i32
    %c0_i32_0 = arith.constant 0 : i32
    return %arg0, %arg1, %c0_i32 : i32, i32, i32
  }
  func.func @transform_1(%arg0: i32, %arg1: i32, %arg2: i32) -> (i32, i32, i32) {
    %c0_i32 = arith.constant 0 : i32
    %c0_i32_0 = arith.constant 0 : i32
    return %arg0, %arg2, %c0_i32 : i32, i32, i32
  }
  func.func @transform_2(%arg0: i32, %arg1: i32, %arg2: i32) -> (i32, i32) {
    %c0_i32 = arith.constant 0 : i32
    %c0_i32_0 = arith.constant 0 : i32
    %c0_i32_1 = arith.constant 0 : i32
    return %c0_i32, %c0_i32_0 : i32, i32
  }
  func.func @transform_3(%arg0: i32, %arg1: i32, %arg2: i32) -> (i32, i32) {
    %c0_i32 = arith.constant 0 : i32
    %c0_i32_0 = arith.constant 0 : i32
    %c0_i32_1 = arith.constant 0 : i32
    return %c0_i32, %c0_i32_0 : i32, i32
  }
  func.func @transform_4(%arg0: i32, %arg1: i32, %arg2: i32) -> (i32, i32) {
    %c0_i32 = arith.constant 0 : i32
    %c0_i32_0 = arith.constant 0 : i32
    %c0_i32_1 = arith.constant 0 : i32
    return %c0_i32, %c0_i32_0 : i32, i32
  }
  func.func @transform_5(%arg0: i32, %arg1: i32, %arg2: i32) -> (i32, i32) {
    %c0_i32 = arith.constant 0 : i32
    %c0_i32_0 = arith.constant 0 : i32
    %c0_i32_1 = arith.constant 0 : i32
    return %c0_i32, %c0_i32_0 : i32, i32
  }
  func.func @transform_6(%arg0: i32, %arg1: i32, %arg2: i32) -> (i32, i32) {
    %c0_i32 = arith.constant 0 : i32
    %c0_i32_0 = arith.constant 0 : i32
    %c0_i32_1 = arith.constant 0 : i32
    return %c0_i32, %c0_i32_0 : i32, i32
  }
  func.func @transform_7(%arg0: i32, %arg1: i32, %arg2: i32) -> (i32, i32) {
    %c0_i32 = arith.constant 0 : i32
    %c0_i32_0 = arith.constant 0 : i32
    %c0_i32_1 = arith.constant 0 : i32
    return %c0_i32, %c0_i32_0 : i32, i32
  }
  func.func @transform_8(%arg0: i32, %arg1: i32, %arg2: i32) -> (i32, i32) {
    %c0_i32 = arith.constant 0 : i32
    %c0_i32_0 = arith.constant 0 : i32
    %c0_i32_1 = arith.constant 0 : i32
    return %c0_i32, %c0_i32_0 : i32, i32
  }
  func.func @transform_9(%arg0: i32, %arg1: i32, %arg2: i32) -> (i32, i32) {
    %c0_i32 = arith.constant 0 : i32
    %c0_i32_0 = arith.constant 0 : i32
    %c0_i32_1 = arith.constant 0 : i32
    return %c0_i32, %c0_i32_0 : i32, i32
  }
  func.func @transform_10(%arg0: i32, %arg1: i32, %arg2: i32) -> (i32, i32, i32) {
    %c0_i32 = arith.constant 0 : i32
    %c0_i32_0 = arith.constant 0 : i32
    return %arg0, %arg1, %c0_i32 : i32, i32, i32
  }
}

</mosaic_0001>

<bundles_post_ra>
// kernel: tpu_custom_call.1
= control target key start
LH: loop header
LB: loop body
LE: loop exit
PB: predicated region body
PF: predicated region fallthrough
CT: control target
= control target key end

     0   :  { %s3436_s0 = inlined_call_operand.hbm [shape: bf16[2,16,32], index: 0, kind: input, shape index: {}]   ;;  %s3437_s1 = inlined_call_operand.hbm [shape: bf16[2,16,32], index: 1, kind: input, shape index: {}]   ;;  %s3438_s2 = inlined_call_operand.hbm [shape: bf16[32,32], index: 2, kind: input, shape index: {}]   ;;  %s3439_s3 = inlined_call_operand.hbm [shape: f32[1,32], index: 3, kind: input, shape index: {}]   ;;  %s3440_s4 = inlined_call_operand.hbm [shape: bf16[32,32], index: 4, kind: input, shape index: {}]   ;;  %s3441_s5 = inlined_call_operand.hbm [shape: f32[1,32], index: 5, kind: input, shape index: {}]   ;;  %s3442_s6 = inlined_call_operand.hbm [shape: bf16[32,32], index: 6, kind: input, shape index: {}]   ;;  %s3443_s7 = inlined_call_operand.hbm [shape: f32[1,32], index: 7, kind: input, shape index: {}]   ;;  %s3444_s8 = inlined_call_operand.hbm [shape: bf16[32,32], index: 8, kind: input, shape index: {}]   ;;  %s3445_s9 = inlined_call_operand.hbm [shape: f32[1,32], index: 9, kind: input, shape index: {}]   ;;  %s3446_s10 = inlined_call_operand.hbm [shape: f32[2,16,32], index: 10, kind: output, shape index: {}]  }
   0x1   :  { %3467 = sst [smem:[#allocation45_spill]] %s3436_s0 }
   0x2   :  { %3468 = sst [smem:[#allocation46_spill]] %s3437_s1 }
   0x3   :  { %3469 = sst [smem:[#allocation47_spill]] %s3438_s2 }
   0x4   :  { %3470 = sst [smem:[#allocation48_spill]] %s3439_s3 }
   0x5   :  { %3471 = sst [smem:[#allocation49_spill]] %s3440_s4 }
   0x6   :  { %3472 = sst [smem:[#allocation50_spill]] %s3441_s5 }
   0x7   :  { %3473 = sst [smem:[#allocation51_spill]] %s3442_s6 }
   0x8   :  { %3474 = sst [smem:[#allocation52_spill]] %s3443_s7 }
   0x9   :  { %3475 = sst [smem:[#allocation53_spill]] %s3444_s8 }
   0xa   :  { %3476 = sst [smem:[#allocation54_spill]] %s3445_s9 }
   0xb   :  { %3477 = sst [smem:[#allocation55_spill]] %s3446_s10 }
   0xc   :  { %15 = vsyncpa [#allocation10], 0 }
   0xd   :  { %17 = vsyncpa [#allocation10 + $0x1], 0 }
   0xe   :  { %18 = vsyncpa [#allocation13], 0 }
   0xf   :  { %20 = vsyncpa [#allocation13 + $0x1], 0 }
  0x10   :  { %21 = vsyncpa [#allocation16], 0 }
  0x11   :  { %22 = vsyncpa [#allocation19], 0 }
  0x12   :  { %23 = vsyncpa [#allocation22], 0 }
  0x13   :  { %24 = vsyncpa [#allocation25], 0 }
  0x14   :  { %25 = vsyncpa [#allocation11], 0 }
  0x15   :  { %27 = vsyncpa [#allocation11 + $0x1], 0  ;;  %s2764_s13 = smov 0   ;;  %s2766_s14 = smov 0  }
  0x16   :  { %s2768_s15 = smov 0   ;;  %s2770_s16 = smov 0  }
  0x17   :  { %s2772_s17 = smov 0   ;;  %s2774_s18 = smov 0  }
  0x18   :  { %s2776_s19 = smov 0   ;;  %s2778_s20 = smov 0  }
  0x19   :  { %s2780_s21 = smov 0   ;;  %s2782_s22 = smov 0  }
  0x1a   :  { %s2784_s23 = smov 0   ;;  %s2786_s24 = smov 0  }
  0x1b   :  { %s2788_s25 = smov 0  }
  0x1c LB: > { %3478 = sst [smem:[#allocation35_spill]] %s2626_s13  ;;  %s2830_s26 = sadd.s32 4294967295, %s2674_s25   ;;  %s2674_s25 = sphi %s2788_s25, %s33_s25   ;;  %s2670_s24 = sphi %s2786_s24, %s3558_s24   ;;  %s2666_s23 = sphi %s2784_s23, %s3557_s23   ;;  %s2662_s22 = sphi %s2782_s22, %s3556_s22   ;;  %s2658_s21 = sphi %s2780_s21, %s3555_s21   ;;  %s2654_s20 = sphi %s2778_s20, %s3554_s20   ;;  %s2650_s19 = sphi %s2776_s19, %s3553_s19   ;;  %s2646_s18 = sphi %s2774_s18, %s3552_s18   ;;  %s2642_s17 = sphi %s2772_s17, %s3551_s17   ;;  %s2638_s16 = sphi %s2770_s16, %s3550_s16   ;;  %s2634_s15 = sphi %s2768_s15, %s3549_s15   ;;  %s2630_s14 = sphi %s2766_s14, %s3544_s14   ;;  %s2626_s13 = sphi %s2764_s13, %s3548_s13  }
  0x1d   : > { %3479 = sst [smem:[#allocation36_spill]] %s2630_s14  ;;  %p1752_p0 = scmp.ge.s32.totalorder %s2674_s25, 1 }
  0x1e   : > { %3480 = sst [smem:[#allocation37_spill]] %s2634_s15  ;;  %p3457_p1 = scmp.eq.s32.totalorder %s2830_s26, 0 }
  0x1f   : > { %3481 = sst [smem:[#allocation38_spill]] %s2650_s19  ;;  %p309_p2 = scmp.lt.s32.totalorder %s2674_s25, 9 }
  0x20   : > { %3482 = sst [smem:[#allocation39_spill]] %s2654_s20  ;;  %s2676_s28 = smov [#allocation14]  }
  0x21   : > { %3483 = sst [smem:[#allocation40_spill]] %s2658_s21  ;;  %p2835_p3 = pnand %p1752_p0, %p309_p2 }
  0x22   : > { %3484 = sst [smem:[#allocation41_spill]] %s2830_s26  ;;  %s321_s29 = sshll.u32 %s2676_s28, 4  ;;  %s2839_s29 = int_to_ptr.vmem [resolvable:$true] %s321_s29 }
  0x23   : > { %s3485_s27 = scalar_select %p2835_p3, 1, 0 }
  0x24   : > { %p2004_p4 = pneg %p2835_p3  ;;  %s2677_s11 = smov [#allocation15]  }
  0x25   : > { %3486 = sst [smem:[#allocation42_spill]] %s3485_s27  ;;  %s335_s12 = sshll.u32 %s2677_s11, 4  ;;  %s2849_s12 = int_to_ptr.vmem [resolvable:$true] %s335_s12 }
  0x26   : > { %p2845_p5 = pnand %p2004_p4, %p3457_p1  ;;  %s2678_s10 = smov [#allocation18]  }
  0x27   : > { %s2851_s21 = sshll.u32 %s2678_s10, 4  ;;  %s3488_s2 = sld [smem:[#allocation47_spill]]  ;;  %s360_s21 = int_to_ptr.vmem [resolvable:$true] %s2851_s21 }
  0x28   : > { %p2861_p7 = pneg %p2845_p5 }
  0x2d   : > { %s2228_s28 = scalar_lea.hbm %s3488_s2, 256 }
  0x2e   : > { %p2229_p6 = scmp.ne.s32.totalorder %s3488_s2, %s2228_s28  ;;  %p2235_p10 = scmp.lt.u32.totalorder %s2228_s28, %s3488_s2 }
  0x30   : > { %p2231_p8 = pnand %p2861_p7, %p2229_p6 }
  0x32   : > { %p2232_p9 = pneg %p2231_p8 }
  0x34   : > { %p2237_p11 = pnand %p2235_p10, %p2232_p9 }
  0x36   : > { %2240 = shalt.err (!%p2237_p11)
}
  0x37   : > { %s2241_s1 = scalar_lea.vmem %s2839_s29, 256  ;;  %p2249_p2 = scmp.lt.s32.totalorder %s2839_s29, %s2839_s29 }
  0x38   : > { %p2242_p12 = scmp.ne.s32.totalorder %s2839_s29, %s2241_s1  ;;  %p2250_p4 = scmp.lt.s32.totalorder %s2241_s1, %s2241_s1 }
  0x3a   : > { %p2244_p13 = pnand %p2242_p12, %p2861_p7  ;;  %p2251_p6 = por %p2250_p4, %p2249_p2 }
  0x3c   : > { %p2245_p0 = pneg %p2244_p13 }
  0x3e   : > { %p2252_p8 = pnand %p2251_p6, %p2245_p0 }
  0x40   : > { %2255 = shalt.err (!%p2252_p8)
}
  0x41   : > { %s3459_s19 = smov 64   ;;  %s2680_s20 = smov 4  }
  0x42   : > { %2007 = dma.hbm_to_vmem [thread:$0]  (!%p2845_p5), %s3488_s2, 256, %s2839_s29, [#allocation13], %s3459_s19, %s3459_s19, %s2680_s20  }
  0x43   : > { %s3490_s3 = sld [smem:[#allocation48_spill]] }
  0x49   : > { %s2256_s1 = scalar_lea.hbm %s3490_s3, 16 }
  0x4a   : > { %p2257_p9 = scmp.ne.s32.totalorder %s3490_s3, %s2256_s1  ;;  %p2263_p12 = scmp.lt.u32.totalorder %s2256_s1, %s3490_s3 }
  0x4c   : > { %p2259_p10 = pnand %p2257_p9, %p2861_p7 }
  0x4e   : > { %p2260_p11 = pneg %p2259_p10 }
  0x50   : > { %p2265_p13 = pnand %p2263_p12, %p2260_p11 }
  0x52   : > { %2268 = shalt.err (!%p2265_p13)
}
  0x53   : > { %s2269_s29 = scalar_lea.vmem %s2849_s12, 16  ;;  %s2276_s14 = scalar_lea.vmem %s2849_s12, 32 }
  0x54   : > { %p2270_p0 = scmp.ne.s32.totalorder %s2849_s12, %s2269_s29  ;;  %p2277_p6 = scmp.lt.s32.totalorder %s2849_s12, %s2849_s12 }
  0x55   : > { %p2278_p8 = scmp.lt.s32.totalorder %s2276_s14, %s2269_s29 }
  0x56   : > { %p2272_p2 = pnand %p2270_p0, %p2861_p7 }
  0x57   : > { %p2279_p9 = por %p2278_p8, %p2277_p6 }
  0x58   : > { %p2273_p4 = pneg %p2272_p2 }
  0x5a   : > { %p2280_p10 = pnand %p2279_p9, %p2273_p4 }
  0x5c   : > { %2283 = shalt.err (!%p2280_p10)
}
  0x5d   : > { %2010 = dma.hbm_to_vmem [thread:$0]  (!%p2845_p5), %s3490_s3, 16, %s2849_s12, [#allocation16]  }
  0x5e   : > { %s3491_s5 = sld [smem:[#allocation50_spill]] }
  0x64   : > { %s2284_s28 = scalar_lea.hbm %s3491_s5, 16 }
  0x65   : > { %p2285_p11 = scmp.ne.s32.totalorder %s3491_s5, %s2284_s28  ;;  %p2291_p0 = scmp.lt.u32.totalorder %s2284_s28, %s3491_s5 }
  0x67   : > { %p2287_p12 = pnand %p2285_p11, %p2861_p7 }
  0x69   : > { %p2288_p13 = pneg %p2287_p12 }
  0x6b   : > { %p2293_p2 = pnand %p2291_p0, %p2288_p13 }
  0x6d   : > { %2296 = shalt.err (!%p2293_p2)
}
  0x6e   : > { %s2297_s14 = scalar_lea.vmem %s360_s21, 16  ;;  %s2304_s12 = scalar_lea.vmem %s360_s21, 32 }
  0x6f   : > { %p2298_p4 = scmp.ne.s32.totalorder %s360_s21, %s2297_s14  ;;  %p2305_p9 = scmp.lt.s32.totalorder %s360_s21, %s360_s21 }
  0x70   : > { %p2306_p10 = scmp.lt.s32.totalorder %s2304_s12, %s2297_s14 }
  0x71   : > { %p2300_p6 = pnand %p2298_p4, %p2861_p7 }
  0x72   : > { %p2307_p1 = por %p2306_p10, %p2305_p9 }
  0x73   : > { %p2301_p8 = pneg %p2300_p6 }
  0x75   : > { %p2308_p3 = pnand %p2307_p1, %p2301_p8 }
  0x77   : > { %2311 = shalt.err (!%p2308_p3)
}
  0x78   : > { %2016 = dma.hbm_to_vmem [thread:$0]  (!%p2845_p5), %s3491_s5, 16, %s360_s21, [#allocation19]  }
  0x79   : > { %s2681_s26 = smov [#allocation21]   ;;  %s2682_s28 = smov [#allocation17]  }
  0x7a   : > { %s383_s27 = sshll.u32 %s2681_s26, 4  ;;  %s345_s11 = sshll.u32 %s2682_s28, 4  ;;  %s384_s27 = int_to_ptr.vmem [resolvable:$true] %s383_s27  ;;  %s346_s11 = int_to_ptr.vmem [resolvable:$true] %s345_s11 }
  0x7b   : > { %s3492_s7 = sld [smem:[#allocation52_spill]] }
  0x81   : > { %s2312_s29 = scalar_lea.hbm %s3492_s7, 16 }
  0x82   : > { %p2313_p1 = scmp.ne.s32.totalorder %s3492_s7, %s2312_s29  ;;  %p2319_p12 = scmp.lt.u32.totalorder %s2312_s29, %s3492_s7 }
  0x84   : > { %p2315_p3 = pnand %p2313_p1, %p2861_p7 }
  0x86   : > { %p2316_p11 = pneg %p2315_p3 }
  0x88   : > { %p2321_p13 = pnand %p2319_p12, %p2316_p11 }
  0x8a   : > { %2324 = shalt.err (!%p2321_p13)
}
  0x8b   : > { %s2325_s21 = scalar_lea.vmem %s384_s27, 16  ;;  %s2332_s15 = scalar_lea.vmem %s384_s27, 32 }
  0x8c   : > { %p2326_p0 = scmp.ne.s32.totalorder %s384_s27, %s2325_s21  ;;  %p2333_p6 = scmp.lt.s32.totalorder %s384_s27, %s384_s27 }
  0x8d   : > { %p2334_p8 = scmp.lt.s32.totalorder %s2332_s15, %s2325_s21 }
  0x8e   : > { %p2328_p2 = pnand %p2326_p0, %p2861_p7 }
  0x8f   : > { %p2335_p9 = por %p2334_p8, %p2333_p6 }
  0x90   : > { %p2329_p4 = pneg %p2328_p2 }
  0x92   : > { %p2336_p10 = pnand %p2335_p9, %p2329_p4 }
  0x94   : > { %2339 = shalt.err (!%p2336_p10)
}
  0x95   : > { %2022 = dma.hbm_to_vmem [thread:$0]  (!%p2845_p5), %s3492_s7, 16, %s384_s27, [#allocation22]  }
  0x96   : > { %s3493_s4 = sld [smem:[#allocation49_spill]] }
  0x9c   : > { %s2340_s1 = scalar_lea.hbm %s3493_s4, 256 }
  0x9d   : > { %p2341_p1 = scmp.ne.s32.totalorder %s3493_s4, %s2340_s1  ;;  %p2347_p12 = scmp.lt.u32.totalorder %s2340_s1, %s3493_s4 }
  0x9f   : > { %p2343_p3 = pnand %p2341_p1, %p2861_p7 }
  0xa1   : > { %p2344_p11 = pneg %p2343_p3 }
  0xa3   : > { %p2349_p13 = pnand %p2347_p12, %p2344_p11 }
  0xa5   : > { %2352 = shalt.err (!%p2349_p13)
}
  0xa6   : > { %s2353_s21 = scalar_lea.vmem %s346_s11, 256  ;;  %p2361_p6 = scmp.lt.s32.totalorder %s346_s11, %s346_s11 }
  0xa7   : > { %p2354_p0 = scmp.ne.s32.totalorder %s346_s11, %s2353_s21  ;;  %p2362_p8 = scmp.lt.s32.totalorder %s2353_s21, %s2353_s21 }
  0xa9   : > { %p2356_p2 = pnand %p2354_p0, %p2861_p7  ;;  %p2363_p9 = por %p2362_p8, %p2361_p6 }
  0xab   : > { %p2357_p4 = pneg %p2356_p2 }
  0xad   : > { %p2364_p10 = pnand %p2363_p9, %p2357_p4 }
  0xaf   : > { %2367 = shalt.err (!%p2364_p10)
}
  0xb0   : > { %s3494_s27 = smov 64   ;;  %s2683_s28 = smov [#allocation20]  }
  0xb1   : > { %2013 = dma.hbm_to_vmem [thread:$0]  (!%p2845_p5), %s3493_s4, 256, %s346_s11, [#allocation16], %s3494_s27, %s3494_s27, %s2680_s20  }
  0xb2   : > { %s369_s19 = sshll.u32 %s2683_s28, 4  ;;  %s2684_s10 = smov [#allocation23]   ;;  %s370_s19 = int_to_ptr.vmem [resolvable:$true] %s369_s19 }
  0xb3   : > { %s393_s1 = sshll.u32 %s2684_s10, 4  ;;  %s3495_s6 = sld [smem:[#allocation51_spill]]  ;;  %s394_s1 = int_to_ptr.vmem [resolvable:$true] %s393_s1 }
  0xb9   : > { %s2368_s12 = scalar_lea.hbm %s3495_s6, 256 }
  0xba   : > { %p2369_p1 = scmp.ne.s32.totalorder %s3495_s6, %s2368_s12  ;;  %p2375_p12 = scmp.lt.u32.totalorder %s2368_s12, %s3495_s6 }
  0xbc   : > { %p2371_p3 = pnand %p2369_p1, %p2861_p7 }
  0xbe   : > { %p2372_p11 = pneg %p2371_p3 }
  0xc0   : > { %p2377_p13 = pnand %p2375_p12, %p2372_p11 }
  0xc2   : > { %2380 = shalt.err (!%p2377_p13)
}
  0xc3   : > { %s2381_s11 = scalar_lea.vmem %s370_s19, 256  ;;  %p2389_p6 = scmp.lt.s32.totalorder %s370_s19, %s370_s19 }
  0xc4   : > { %p2382_p0 = scmp.ne.s32.totalorder %s370_s19, %s2381_s11  ;;  %p2390_p8 = scmp.lt.s32.totalorder %s2381_s11, %s2381_s11 }
  0xc6   : > { %p2384_p2 = pnand %p2382_p0, %p2861_p7  ;;  %p2391_p9 = por %p2390_p8, %p2389_p6 }
  0xc8   : > { %p2385_p4 = pneg %p2384_p2 }
  0xca   : > { %p2392_p10 = pnand %p2391_p9, %p2385_p4 }
  0xcc   : > { %2395 = shalt.err (!%p2392_p10)
}
  0xcd   : > { %2019 = dma.hbm_to_vmem [thread:$0]  (!%p2845_p5), %s3495_s6, 256, %s370_s19, [#allocation19], %s3494_s27, %s3494_s27, %s2680_s20  }
  0xce   : > { %s3496_s8 = sld [smem:[#allocation53_spill]] }
  0xd4   : > { %s2396_s29 = scalar_lea.hbm %s3496_s8, 256 }
  0xd5   : > { %p2397_p1 = scmp.ne.s32.totalorder %s3496_s8, %s2396_s29  ;;  %p2403_p12 = scmp.lt.u32.totalorder %s2396_s29, %s3496_s8 }
  0xd7   : > { %p2399_p3 = pnand %p2397_p1, %p2861_p7 }
  0xd9   : > { %p2400_p11 = pneg %p2399_p3 }
  0xdb   : > { %p2405_p13 = pnand %p2403_p12, %p2400_p11 }
  0xdd   : > { %2408 = shalt.err (!%p2405_p13)
}
  0xde   : > { %s2409_s15 = scalar_lea.vmem %s394_s1, 256  ;;  %p2417_p6 = scmp.lt.s32.totalorder %s394_s1, %s394_s1 }
  0xdf   : > { %p2410_p0 = scmp.ne.s32.totalorder %s394_s1, %s2409_s15  ;;  %p2418_p8 = scmp.lt.s32.totalorder %s2409_s15, %s2409_s15 }
  0xe1   : > { %p2412_p2 = pnand %p2410_p0, %p2861_p7  ;;  %p2419_p9 = por %p2418_p8, %p2417_p6 }
  0xe3   : > { %p2413_p4 = pneg %p2412_p2 }
  0xe5   : > { %p2420_p10 = pnand %p2419_p9, %p2413_p4 }
  0xe7   : > { %2423 = shalt.err (!%p2420_p10)
}
  0xe8   : > { %2025 = dma.hbm_to_vmem [thread:$0]  (!%p2845_p5), %s3496_s8, 256, %s394_s1, [#allocation22], %s3494_s27, %s3494_s27, %s2680_s20  }
  0xe9   : > { %s2685_s2 = smov [#allocation24]   ;;  %s3497_s9 = sld [smem:[#allocation54_spill]] }
  0xea   : > { %s407_s26 = sshll.u32 %s2685_s2, 4  ;;  %s408_s26 = int_to_ptr.vmem [resolvable:$true] %s407_s26 }
  0xef   : > { %s2424_s29 = scalar_lea.hbm %s3497_s9, 16 }
  0xf0   : > { %p2425_p1 = scmp.ne.s32.totalorder %s3497_s9, %s2424_s29  ;;  %p2431_p12 = scmp.lt.u32.totalorder %s2424_s29, %s3497_s9 }
  0xf2   : > { %p2427_p3 = pnand %p2425_p1, %p2861_p7 }
  0xf4   : > { %p2428_p11 = pneg %p2427_p3 }
  0xf6   : > { %p2433_p13 = pnand %p2431_p12, %p2428_p11 }
  0xf8   : > { %2436 = shalt.err (!%p2433_p13)
}
  0xf9   : > { %s2437_s20 = scalar_lea.vmem %s408_s26, 16  ;;  %s2444_s27 = scalar_lea.vmem %s408_s26, 32 }
  0xfa   : > { %p2438_p0 = scmp.ne.s32.totalorder %s408_s26, %s2437_s20  ;;  %p2445_p6 = scmp.lt.s32.totalorder %s408_s26, %s408_s26 }
  0xfb   : > { %p2446_p8 = scmp.lt.s32.totalorder %s2444_s27, %s2437_s20 }
  0xfc   : > { %p2440_p2 = pnand %p2438_p0, %p2861_p7 }
  0xfd   : > { %p2447_p9 = por %p2446_p8, %p2445_p6 }
  0xfe   : > { %p2441_p4 = pneg %p2440_p2 }
 0x100   : > { %p2448_p10 = pnand %p2447_p9, %p2441_p4 }
 0x102   : > { %2451 = shalt.err (!%p2448_p10)
}
 0x103   : > { %2028 = dma.hbm_to_vmem [thread:$0]  (!%p2845_p5), %s3497_s9, 16, %s408_s26, [#allocation25]  }
 0x104   : > { %s1751_s13 = sadd.s32 4294967294, %s2674_s25   ;;  %s45_s30 = sadd.s32 1, %s2662_s22 }
 0x105   : > { %s3498_s19 = sld [smem:[#allocation41_spill]]  ;;  %p46_p7 = scmp.ge.s32.totalorder %s45_s30, 2 }
 0x106   : > { %s48_s11 = sadd.s32 1, %s2666_s23  ;;  %s52_s2 = sadd.s32 1, %s2670_s24 }
 0x107   : > { %s61_s28 = sadd.s32 1, %s2646_s18  ;;  %s3560_s30 = smov (%p46_p7, %s45_s30), 0 }
 0x108   : > { %s3562_s11 = smov (!%p46_p7, %s48_s11), %s2666_s23  ;;  %p68_p5 = scmp.ne.s32.totalorder %s2646_s18, %s2642_s17 }
 0x109   : > { %p3464_p1 = scmp.eq.s32.totalorder %s2674_s25, 0  ;;  %p50_p3 = scmp.ge.s32.totalorder %s3562_s11, 2 }
 0x10a   : > { %p74_p11 = scmp.ne.s32.totalorder %s2642_s17, %s2638_s16  ;;  %s85_s10 = ssub.s32 %s2662_s22, %s3560_s30 }
 0x10b   : > { %p3045_p12 = por %p3464_p1, %p68_p5  ;;  %s3564_s11 = smov (%p50_p3, %s3562_s11), 0 }
 0x10c   : > { %3500 = sst [smem:[#allocation43_spill]] %s3564_s11  ;;  %s3566_s2 = smov (!%p50_p3, %s52_s2), %s2670_s24 }
 0x10d   : > { %s57_s29 = ssub.s32 %s2666_s23, %s3564_s11  ;;  %p3501_p13 = scmp.eq.s32.totalorder %s3498_s19, 0 }
 0x10e   : > { %p54_p2 = scmp.ge.s32.totalorder %s3566_s2, 2  ;;  %p296_p4 = scmp.eq.s32.totalorder %s3498_s19, 7 }
 0x10f   : > { %p3061_p0 = por %p3501_p13, %p74_p11  ;;  %p302_p6 = scmp.eq.s32.totalorder %s1751_s13, 7 }
 0x110   : > { %p3463_p8 = scmp.lt.s32.totalorder %s2674_s25, 8  ;;  %s3568_s2 = smov (%p54_p2, %s3566_s2), 0 }
 0x111   : > { %3503 = sst [smem:[#allocation44_spill]] %s3568_s2  ;;  %p3072_p9 = por %p296_p4, %p68_p5 }
 0x112   : > { %p3079_p10 = por %p302_p6, %p74_p11  ;;  %s56_s21 = ssub.s32 %s2670_s24, %s3568_s2 }
 0x113   : > { %s3504_s12 = scalar_select %p3072_p9, 1, 0 }
 0x114   : > { %s3505_s0 = scalar_select %p3079_p10, 1, 0 }
 0x115   : > { %s418_s20 = sand.u32 1, %s2646_s18   ;;  %s58_s27 = sor.u32 %s57_s29, %s56_s21 }
 0x116   : > { %s3086_s1 = sor.u32 %s85_s10, %s56_s21  ;;  %p59_p7 = scmp.eq.s32.totalorder %s58_s27, 0 }
 0x117   : > { %s1762_s15 = sshll.u32 %s418_s20, 2  ;;  %s1763_s3 = sshll.u32 %s2670_s24, 1 }
 0x118   : > { %s3090_s13 = scalar_select %p59_p7, %s2646_s18, %s61_s28  }
 0x119   : > { %s427_s4 = sadd.s32 %s2666_s23, %s1763_s3  ;;  %s422_s5 = scalar_lea.vmem [#allocation9], %s1762_s15 }
 0x11a   : > { %s431_s6 = sshll.u32 %s422_s5, 4  ;;  %s1764_s7 = sshll.u32 %s427_s4, 6  ;;  %s3094_s6 = int_to_ptr.vmem [resolvable:$true] %s431_s6 }
 0x11b   : > { %s3506_s2 = sld [smem:[#allocation45_spill]]  ;;  %p3105_p5 = pnand %p3463_p8, %p3045_p12 }
 0x11c   : > { %s3110_s4 = sadd.s32 %s2662_s22, %s1763_s3  ;;  %s419_s5 = scalar_lea.sflag [#allocation10], %s418_s20 }
 0x11d   : > { %p2454_p13 = pneg %p3105_p5 }
 0x121   : > { %s3099_s11 = scalar_lea.hbm %s3506_s2, %s1764_s7  ;;  %s2457_s9 = scalar_lea.hbm %s3506_s2, 256 }
 0x122   : > { %s2452_s10 = scalar_lea.hbm %s3099_s11, 64  ;;  %p2458_p12 = scmp.lt.u32.totalorder %s3099_s11, %s3506_s2 }
 0x123   : > { %p2453_p11 = scmp.ne.s32.totalorder %s3099_s11, %s2452_s10  ;;  %p2459_p6 = scmp.lt.u32.totalorder %s2457_s9, %s2452_s10 }
 0x124   : > { %p2461_p8 = scmp.lt.u32.totalorder %s2452_s10, %s3099_s11 }
 0x125   : > { %p2455_p2 = pnand %p2454_p13, %p2453_p11  ;;  %p2460_p7 = por %p2459_p6, %p2458_p12 }
 0x127   : > { %p2456_p4 = pneg %p2455_p2  ;;  %p2462_p1 = por %p2461_p8, %p2460_p7 }
 0x129   : > { %p2463_p3 = pnand %p2462_p1, %p2456_p4 }
 0x12b   : > { %2466 = shalt.err (!%p2463_p3)
}
 0x12c   : > { %s2467_s3 = scalar_lea.vmem %s3094_s6, 64  ;;  %s2686_s21 = smov [#allocation9]  }
 0x12d   : > { %p2468_p11 = scmp.ne.s32.totalorder %s3094_s6, %s2467_s3  ;;  %s2472_s20 = sshll.u32 %s2686_s21, 4  ;;  %s2473_s20 = int_to_ptr.vmem [resolvable:$false] %s2472_s20 }
 0x12e   : > { %s2474_s27 = scalar_lea.vmem %s2473_s20, 128  ;;  %p2475_p9 = scmp.lt.s32.totalorder %s3094_s6, %s2473_s20 }
 0x12f   : > { %p2470_p2 = pnand %p2468_p11, %p2454_p13  ;;  %p2476_p12 = scmp.lt.s32.totalorder %s2474_s27, %s2467_s3 }
 0x131   : > { %p2471_p10 = pneg %p2470_p2  ;;  %p2477_p6 = por %p2476_p12, %p2475_p9 }
 0x133   : > { %p2478_p8 = pnand %p2477_p6, %p2471_p10 }
 0x135   : > { %2481 = shalt.err (!%p2478_p8)
}
 0x136   : > { %s3508_s15 = sld [smem:[#allocation37_spill]]  ;;  %s3509_s10 = sld [smem:[#allocation36_spill]] }
 0x137   : > { %s3510_s7 = sld [smem:[#allocation35_spill]]  ;;  %p3511_p9 = scmp.eq.s32.totalorder %s3086_s1, 0 }
 0x138   : > { %2032 = dma.hbm_to_vmem [thread:$0]  (!%p3105_p5), %s3099_s11, 64, %s3094_s6, %s419_s5  }
 0x139   : > { %p3512_p10 = scmp.eq.s32.totalorder %s2674_s25, 0  ;;  %s438_s9 = sand.u32 1, %s2674_s25  }
 0x13a   : > { %p3513_p4 = scmp.eq.s32.totalorder %s3498_s19, 0  ;;  %s1767_s21 = sshll.u32 %s3110_s4, 6 }
 0x13b   : > { %s3515_s6 = sld [smem:[#allocation46_spill]]  ;;  %p3516_p5 = scmp.lt.s32.totalorder %s2674_s25, 8 }
 0x13c   : > { %s89_s8 = sadd.s32 1, %s3508_s15  ;;  %p96_p1 = scmp.ne.s32.totalorder %s3508_s15, %s3509_s10 }
 0x13d   : > { %s3143_s28 = scalar_select %p3511_p9, %s3508_s15, %s89_s8  }
 0x13e   : > { %p98_p3 = por %p96_p1, %p3512_p10  ;;  %p102_p13 = scmp.ne.s32.totalorder %s3509_s10, %s3510_s7 }
 0x13f   : > { %s440_s26 = sand.u32 1, %s3508_s15   ;;  %s439_s4 = scalar_lea.sflag [#allocation13], %s438_s9 }
 0x140   : > { %p3153_p7 = por %p102_p13, %p3513_p4  ;;  %s1765_s3 = sshll.u32 %s440_s26, 2 }
 0x141   : > { %s3161_s11 = scalar_lea.hbm %s3515_s6, %s1767_s21  ;;  %s442_s1 = scalar_lea.vmem [#allocation12], %s1765_s3 }
 0x142   : > { %s3514_s29 = scalar_select %p3153_p7, 1, 0 }
 0x143   : > { %s451_s5 = sshll.u32 %s442_s1, 4  ;;  %p3165_p11 = pnand %p3516_p5, %p98_p3  ;;  %s3169_s5 = int_to_ptr.vmem [resolvable:$true] %s451_s5 }
 0x144   : > { %s2482_s15 = scalar_lea.hbm %s3161_s11, 64  ;;  %s2487_s8 = scalar_lea.hbm %s3515_s6, 256 }
 0x145   : > { %p2483_p2 = scmp.ne.s32.totalorder %s3161_s11, %s2482_s15  ;;  %p2484_p12 = pneg %p3165_p11 }
 0x146   : > { %p2488_p1 = scmp.lt.u32.totalorder %s3161_s11, %s3515_s6  ;;  %p2489_p9 = scmp.lt.u32.totalorder %s2487_s8, %s2482_s15 }
 0x147   : > { %p2485_p6 = pnand %p2484_p12, %p2483_p2  ;;  %p2491_p3 = scmp.lt.u32.totalorder %s2482_s15, %s3161_s11 }
 0x148   : > { %p2490_p10 = por %p2489_p9, %p2488_p1 }
 0x149   : > { %p2486_p8 = pneg %p2485_p6 }
 0x14a   : > { %p2492_p13 = por %p2491_p3, %p2490_p10 }
 0x14c   : > { %p2493_p4 = pnand %p2492_p13, %p2486_p8 }
 0x14e   : > { %2496 = shalt.err (!%p2493_p4)
}
 0x14f   : > { %s2497_s9 = scalar_lea.vmem %s3169_s5, 64  ;;  %s2687_s21 = smov [#allocation12]  }
 0x150   : > { %p2498_p5 = scmp.ne.s32.totalorder %s3169_s5, %s2497_s9  ;;  %s2502_s20 = sshll.u32 %s2687_s21, 4  ;;  %s2503_s20 = int_to_ptr.vmem [resolvable:$false] %s2502_s20 }
 0x151   : > { %s2504_s27 = scalar_lea.vmem %s2503_s20, 128  ;;  %p2505_p7 = scmp.lt.s32.totalorder %s3169_s5, %s2503_s20 }
 0x152   : > { %p2500_p2 = pnand %p2498_p5, %p2484_p12  ;;  %p2506_p1 = scmp.lt.s32.totalorder %s2504_s27, %s2497_s9 }
 0x154   : > { %p2501_p6 = pneg %p2500_p2  ;;  %p2507_p9 = por %p2506_p1, %p2505_p7 }
 0x156   : > { %p2508_p10 = pnand %p2507_p9, %p2501_p6 }
 0x158   : > { %2511 = shalt.err (!%p2508_p10)
}
 0x159   : > { %2035 = dma.hbm_to_vmem [thread:$0]  (!%p3165_p11), %s3161_s11, 64, %s3169_s5, %s439_s4  }
 0x15a   : > { %s3518_s1 = sld [smem:[#allocation42_spill]] }
 0x160   : > { %p3519_p8 = scmp.ne.s32.totalorder %s3518_s1, 0 }
 0x161   : > { %s3199_s15 = sand.u32 (!%p3519_p8), 1, %s2642_s17  }
 0x162   : > { %460 = sbr.rel (%p3519_p8) target bundleno = 2335 (0x91f), region = 60  ;;  %s1769_s10 = sshll.u32 (!%p3519_p8), %s3199_s15, 2 }
 0x163   : > { %s463_s7 = scalar_lea.sflag (!%p3519_p8), [#allocation10], %s3199_s15  ;;  %s3203_s8 = scalar_lea.vmem (!%p3519_p8), [#allocation9], %s1769_s10 }
 0x169   : > { %2593 = dma.done.wait (%p3061_p0), %s463_s7, 64  }
 0x16a   : > { %2595 = vsyncadd (%p3061_p0), %s463_s7, 4294967232  ;;  %s3520_s19 = sld [smem:[#allocation41_spill]]  ;;  %p3522_p7 = scmp.ne.s32.totalorder %s3514_s29, 0 }
 0x16b   : > { %s3521_s11 = sld [smem:[#allocation36_spill]] }
 0x170   : > { %s471_s5 = sand.u32 1, %s3520_s19  }
 0x171   : > { %s473_s4 = sand.u32 1, %s3521_s11   ;;  %s472_s3 = scalar_lea.sflag [#allocation13], %s471_s5 }
 0x172   : > { %s3211_s26 = sshll.u32 %s473_s4, 2 }
 0x173   : > { %s475_s9 = scalar_lea.vmem [#allocation12], %s3211_s26 }
 0x174   : > { %2597 = dma.done.wait (%p3522_p7), %s472_s3, 64  }
 0x175   : > { %2599 = vsyncadd (%p3522_p7), %s472_s3, 4294967232  ;;  %p3523_p11 = scmp.eq.s32.totalorder %s3520_s19, 0 }
 0x177   : > { %2601 = dma.done.wait (%p3523_p11), [#allocation13], 256   ;;  %p3524_p0 = pmov %p3523_p11 }
 0x179   : > { %2603 = vsyncadd (%p3524_p0), [#allocation13], 4294967040  ;;  %p3525_p12 = pmov %p3524_p0 }
 0x17a   : > { %p3526_p3 = pmov %p3524_p0 }
 0x17b   : > { %2605 = dma.done.wait (%p3525_p12), [#allocation16], 272  }
 0x17c   : > { %2607 = vsyncadd (%p3526_p3), [#allocation16], 4294967024  ;;  %p3527_p13 = pmov %p3524_p0 }
 0x17d   : > { %p3528_p4 = pmov %p3524_p0 }
 0x17e   : > { %2609 = dma.done.wait (%p3527_p13), [#allocation19], 272  }
 0x17f   : > { %2611 = vsyncadd (%p3528_p4), [#allocation19], 4294967024  ;;  %p3529_p5 = pmov %p3524_p0 }
 0x180   : > { %p3530_p2 = pmov %p3524_p0 }
 0x181   : > { %2613 = dma.done.wait (%p3529_p5), [#allocation22], 272  }
 0x182   : > { %2615 = vsyncadd (%p3530_p2), [#allocation22], 4294967024  ;;  %p3531_p6 = pmov %p3524_p0 }
 0x183   : > { %p3532_p1 = pmov %p3524_p0 }
 0x184   : > { %2617 = dma.done.wait (%p3531_p6), [#allocation25], 16  }
 0x185   : > { %2619 = vsyncadd (%p3532_p1), [#allocation25], 4294967280  ;;  %s1779_s14 = sshll.u32 %s3199_s15, 3  ;;  %s3533_s21 = sld [smem:[#allocation39_spill]] }
 0x186   : > { %s3239_s29 = scalar_lea.vmem [#allocation26], %s1779_s14 }
 0x18b   : > { %p1780_p9 = scmp.ne.s32.totalorder %s3533_s21, 0 }
 0x18c   : > { %v2192_v0 = vld [vmem:[#allocation17] sm:$0xff] (!%p1780_p9)   ;;  %v2688_v1 = vmov (!%p1780_p9), 0.0   ;;  %v2193_v2 = vld [vmem:[#allocation20] sm:$0xff] (!%p1780_p9)   ;;  %v2194_v3 = vld [vmem:[#allocation17 + $0x8] sm:$0xff] (!%p1780_p9)   ;;  %s3534_s20 = sld [smem:[#allocation38_spill]] (!%p1780_p9)  ;;  %vm2689_vm0 = vmmov (!%p1780_p9), 0  }
 0x18d   : > { %553 = sbr.rel (%p1780_p9) target bundleno = 745 (0x2e9), region = 104  ;;  %1886 = vmatprep.subr.bf16.mxu0 (!%p1780_p9), %v2688_v1  ;;  %1894 = vmatprep.subr.bf16.mxu1 (!%p1780_p9), %v2688_v1  ;;  %v2195_v4 = vld [vmem:[#allocation20 + $0x8] sm:$0xff] (!%p1780_p9)   ;;  %v554_v5 = vld [vmem:[%s475_s9] sm:$0xf] (!%p1780_p9)  ;;  %vm578_vm1 = vcmask (!%p1780_p9), 261120   ;;  %vm690_vm2 = vcmask (!%p1780_p9), 60416  }
 0x18e   : > { %1887 = vmatpush3.bf16.msra.mxu0 (!%p1780_p9), %v2192_v0  ;;  %1890 = vmatprep.mubr.msk.bf16.mxu0 (!%p1780_p9), %vm2689_vm0, %v2688_v1  ;;  %v1781_v6 = vld [vmem:[#allocation18] ss:$0 sm:$0xff] (!%p1780_p9)  ;;  %v1785_v7 = vld [vmem:[#allocation21] ss:$0 sm:$0xff] (!%p1780_p9)  ;;  %s2690_s1 = smov (!%p1780_p9), 112   ;;  %s2691_s10 = smov (!%p1780_p9), 120  }
 0x18f   : > { %1895 = vmatpush3.bf16.msra.mxu1 (!%p1780_p9), %v2193_v2  ;;  %1888 = vmatprep.subr.bf16.mxu0 (!%p1780_p9), %v2688_v1  ;;  %s2692_s11 = smov (!%p1780_p9), 104  }
 0x190   : > { %1896 = vmatprep.subr.bf16.mxu1 (!%p1780_p9), %v2688_v1  ;;  %1898 = vmatprep.mubr.msk.bf16.mxu1 (!%p1780_p9), %vm2689_vm0, %v2688_v1 }
 0x192   : > { %1889 = vmatpush3.bf16.msra.mxu0 (!%p1780_p9), %v2194_v3  ;;  %s1842_s27 = sshll.u32 (!%p1780_p9), %s3534_s20, 4 }
 0x193   : > { %1897 = vmatpush3.bf16.msra.mxu1 (!%p1780_p9), %v2195_v4  ;;  %s689_s7 = scalar_lea.vmem (!%p1780_p9), [#allocation3], %s1842_s27  ;;  %s693_s19 = scalar_lea.vmem (!%p1780_p9), [#allocation4], %s1842_s27 }
 0x195   : > { %1891 = vmatmul.mubr.msk.bf16.vlgmr.msra.gmra.mrb[0].mxu0 %vm578_vm1, %v554_v5 }
 0x196   : > { %1899 = vmatmul.mubr.msk.bf16.vlgmr.msra.gmra.mrb[0].mxu1 %vm578_vm1, %v554_v5 }
 0x268   : > { %v616_v8 = vpop.f32.mrb[0].mxu0 }
 0x269   : > { %v617_v9 = vadd.f32 %v1781_v6, %v616_v8  ;;  %v1892_v10 = vpop.f32.mrb[1].mxu0  ;;  %v680_v11 = vpop.f32.mrb[0].mxu1 }
 0x26a   : > { %v681_v12 = vadd.f32 %v1785_v7, %v680_v11  ;;  %v619_v13 = vpop.f32.mrb[2].mxu0  ;;  %v1900_v14 = vpop.f32.mrb[1].mxu1 }
 0x26b   : > { %v622_v15 = vpack.c.bf16 %v617_v9, %v617_v9  ;;  %v1893_v16 = vpop.f32.mrb[3].mxu0  ;;  %v683_v17 = vpop.f32.mrb[2].mxu1 }
 0x26c   : > { %v686_v18 = vpack.c.bf16 %v681_v12, %v681_v12  ;;  %v1901_v19 = vpop.f32.mrb[3].mxu1 }
 0x26d   : > { %714 = vrot.lane.b32.xlu1 %v622_v15, %s2690_s1  ;;  %698 = vrot.lane.b32.xlu0 %v622_v15, %s2691_s10  ;;  %691 = vst.msk [vmem:[%s689_s7] sm:$0xf] %vm690_vm2, %v622_v15 }
 0x26e   : > { %694 = vst.msk [vmem:[%s693_s19] sm:$0xf] %vm690_vm2, %v686_v18 }
 0x271   : > { %721 = vrot.lane.b32.xlu1 %v686_v18, %s2690_s1  ;;  %708 = vrot.lane.b32.xlu0 %v686_v18, %s2691_s10 }
 0x275   : > { %734 = vrot.lane.b32.xlu1 %v686_v18, %s2692_s11  ;;  %727 = vrot.lane.b32.xlu0 %v622_v15, %s2692_s11 }
 0x2df   : > { %v715_v20 = vpop.permute.xlu1 %714  ;;  %v699_v21 = vpop.permute.xlu0 %698 }
 0x2e0   : > { %1802 = vst.msk [vmem:[%s689_s7 + $0x8] sm:$0xf] %vm690_vm2, %v715_v20  ;;  %1795 = vst.msk [vmem:[%s689_s7 + $0x4] sm:$0xf] %vm690_vm2, %v699_v21 }
 0x2e3   : > { %v722_v22 = vpop.permute.xlu1 %721  ;;  %v709_v23 = vpop.permute.xlu0 %708 }
 0x2e4   : > { %1805 = vst.msk [vmem:[%s693_s19 + $0x8] sm:$0xf] %vm690_vm2, %v722_v22  ;;  %1799 = vst.msk [vmem:[%s693_s19 + $0x4] sm:$0xf] %vm690_vm2, %v709_v23 }
 0x2e7   : > { %v735_v24 = vpop.permute.xlu1 %734  ;;  %v728_v25 = vpop.permute.xlu0 %727 }
 0x2e8   : > { %1811 = vst.msk [vmem:[%s693_s19 + $0xc] sm:$0xf] %vm690_vm2, %v735_v24  ;;  %1808 = vst.msk [vmem:[%s689_s7 + $0xc] sm:$0xf] %vm690_vm2, %v728_v25 }
 0x2e9 PF: > { %s3535_s5 = sld [smem:[#allocation38_spill]] }
 0x2ef   : > { %p1812_p10 = scmp.ne.s32.totalorder %s3535_s5, 0 }
 0x2f0   : > { %vm833_vm3 = vcmask (!%p1812_p10), 7168   ;;  %vm842_vm4 = vcmask (!%p1812_p10), 64512   ;;  %v2693_v26 = vmov (!%p1812_p10), 0.0   ;;  %v2694_v27 = vmov (!%p1812_p10), -inf   ;;  %v2196_v28 = vld [vmem:[#allocation14] sm:$0xff] (!%p1812_p10)   ;;  %v2197_v29 = vld [vmem:[#allocation14 + $0x8] sm:$0xff] (!%p1812_p10)  }
 0x2f1   : > { %743 = sbr.rel (%p1812_p10) target bundleno = 1097 (0x449), region = 108  ;;  %1902 = vmatprep.subr.bf16.mxu0 (!%p1812_p10), %v2693_v26  ;;  %834 = vst.msk [vmem:[#allocation5] sm:$0xff] (!%p1812_p10), %vm833_vm3, %v2694_v27  ;;  %835 = vst.msk [vmem:[#allocation5 + $0x8] sm:$0xff] (!%p1812_p10), %vm833_vm3, %v2694_v27  ;;  %vm2695_vm5 = vmmov (!%p1812_p10), 0   ;;  %v744_v30 = vld [vmem:[%s3203_s8] sm:$0xf] (!%p1812_p10) }
 0x2f2   : > { %836 = vst.msk [vmem:[#allocation5 + $0x10] sm:$0xff] (!%p1812_p10), %vm833_vm3, %v2694_v27  ;;  %837 = vst.msk [vmem:[#allocation5 + $0x18] sm:$0xff] (!%p1812_p10), %vm833_vm3, %v2694_v27  ;;  %1906 = vmatprep.mubr.msk.bf16.mxu0 (!%p1812_p10), %vm2695_vm5, %v2693_v26  ;;  %1903 = vmatpush3.bf16.msra.mxu0 (!%p1812_p10), %v2196_v28  ;;  %vm768_vm6 = vcmask (!%p1812_p10), 261120   ;;  %v1813_v31 = vld [vmem:[#allocation15] ss:$0 sm:$0xff] (!%p1812_p10)  ;;  %vm813_vm7 = vcmask (!%p1812_p10), 60416  }
 0x2f3   : > { %838 = vst.msk [vmem:[#allocation6] sm:$0xff] (!%p1812_p10), %vm833_vm3, %v2693_v26  ;;  %839 = vst.msk [vmem:[#allocation6 + $0x8] sm:$0xff] (!%p1812_p10), %vm833_vm3, %v2693_v26  ;;  %1904 = vmatprep.subr.bf16.mxu0 (!%p1812_p10), %v2693_v26  ;;  %s2696_s4 = smov (!%p1812_p10), 104   ;;  %s2697_s26 = smov (!%p1812_p10), 120  }
 0x2f4   : > { %840 = vst.msk [vmem:[#allocation6 + $0x10] sm:$0xff] (!%p1812_p10), %vm833_vm3, %v2693_v26  ;;  %841 = vst.msk [vmem:[#allocation6 + $0x18] sm:$0xff] (!%p1812_p10), %vm833_vm3, %v2693_v26  ;;  %s2698_s3 = smov (!%p1812_p10), 112  }
 0x2f5   : > { %843 = vst.msk [vmem:[#allocation7] sm:$0xff] (!%p1812_p10), %vm842_vm4, %v2693_v26  ;;  %844 = vst.msk [vmem:[#allocation7 + $0x8] sm:$0xff] (!%p1812_p10), %vm842_vm4, %v2693_v26 }
 0x2f6   : > { %845 = vst.msk [vmem:[#allocation7 + $0x10] sm:$0xff] (!%p1812_p10), %vm842_vm4, %v2693_v26  ;;  %846 = vst.msk [vmem:[#allocation7 + $0x18] sm:$0xff] (!%p1812_p10), %vm842_vm4, %v2693_v26  ;;  %1905 = vmatpush3.bf16.msra.mxu0 (!%p1812_p10), %v2197_v29 }
 0x2f9   : > { %1907 = vmatmul.mubr.msk.bf16.vlgmr.msra.gmra.mrb[0].mxu0 %vm768_vm6, %v744_v30 }
 0x3cc   : > { %v806_v32 = vpop.f32.mrb[0].mxu0 }
 0x3cd   : > { %v807_v33 = vadd.f32 %v1813_v31, %v806_v32  ;;  %v1908_v34 = vpop.f32.mrb[1].mxu0 }
 0x3ce   : > { %v809_v35 = vpop.f32.mrb[2].mxu0 }
 0x3cf   : > { %v812_v36 = vpack.c.bf16 %v807_v33, %v807_v33  ;;  %v1909_v37 = vpop.f32.mrb[3].mxu0 }
 0x3d1   : > { %828 = vrot.lane.b32.xlu1 %v812_v36, %s2696_s4  ;;  %818 = vrot.lane.b32.xlu0 %v812_v36, %s2697_s26  ;;  %814 = vst.msk [vmem:[#allocation2] sm:$0xf] %vm813_vm7, %v812_v36 }
 0x3d5   : > { %823 = vrot.lane.b32.xlu0 %v812_v36, %s2698_s3 }
 0x443   : > { %v829_v38 = vpop.permute.xlu1 %828  ;;  %v819_v39 = vpop.permute.xlu0 %818 }
 0x444   : > { %832 = vst.msk [vmem:[#allocation2 + $0xc] sm:$0xf] %vm813_vm7, %v829_v38  ;;  %822 = vst.msk [vmem:[#allocation2 + $0x4] sm:$0xf] %vm813_vm7, %v819_v39 }
 0x447   : > { %v824_v40 = vpop.permute.xlu0 %823 }
 0x448   : > { %827 = vst.msk [vmem:[#allocation2 + $0x8] sm:$0xf] %vm813_vm7, %v824_v40 }
 0x449 PF: > { %s3536_s8 = sld [smem:[#allocation38_spill]]  ;;  %vm864_vm8 = vcmask 64512   ;;  %v2699_v41 = vmov 0.0   ;;  %vm2700_vm9 = vmmov 0   ;;  %v847_v48 = vld [vmem:[#allocation2] sm:$0xf] }
 0x44a   : > { %1910 = vmatprep.subr.bf16.mxu0 %v2699_v41  ;;  %1916 = vmatprep.subr.bf16.mxu1 %v2699_v41  ;;  %v2701_v10 = vmov 0   ;;  %v1049_v11 = vld [vmem:[#allocation5] sm:$0xff]  ;;  %vm1137_vm10 = vcmask 7168   ;;  %v3300_v14 = vld [vmem:[#allocation5 + $0x8] sm:$0xff]  ;;  %v1051_v19 = vld [vmem:[#allocation5 + $0x10] sm:$0xff]  ;;  %vm1149_vm11 = vcmask 1043456  }
 0x44b   : > { %1912 = vmatprep.mubr.msk.bf16.mxu0 %vm2700_vm9, %v2699_v41  ;;  %1918 = vmatprep.mubr.msk.bf16.mxu1 %vm2700_vm9, %v2699_v41  ;;  %v848_v49 = vld [vmem:[#allocation2 + $0x4] sm:$0xf]  ;;  %v850_v53 = vld [vmem:[#allocation2 + $0xc] sm:$0xf] }
 0x44c   : > { %2198 = vset.pattern.permute.xlu0 %v2701_v10  ;;  %2199 = vset.pattern.permute.xlu1 %v2701_v10  ;;  %v3311_v23 = vld [vmem:[#allocation5 + $0x18] sm:$0xff] }
 0x44f   : > { %s1853_s9 = sshll.u32 %s3536_s8, 4  ;;  %v849_v52 = vld [vmem:[#allocation2 + $0x8] sm:$0xf]  ;;  %p1829_p8 = scmp.ne.s32.totalorder %s3536_s8, 1 }
 0x450   : > { %s853_s14 = scalar_lea.vmem [#allocation3], %s1853_s9  ;;  %s859_s21 = scalar_lea.vmem [#allocation4], %s1853_s9  ;;  %vm2704_vm12 = vmmov (!%p1829_p8), 0   ;;  %vm1415_vm13 = vcmask (!%p1829_p8), 60416   ;;  %vm1423_vm14 = vcmask (!%p1829_p8), 126016   ;;  %vm1431_vm15 = vcmask (!%p1829_p8), 191616  }
 0x451   : > { %v854_v42 = vld [vmem:[%s853_s14] sm:$0xf]  ;;  %v855_v43 = vld [vmem:[%s853_s14 + $0x4] sm:$0xf]  ;;  %v856_v46 = vld [vmem:[%s853_s14 + $0x8] sm:$0xf] }
 0x452   : > { %v869_v44 = vsel %vm864_vm8, %v854_v42, 0  ;;  %v915_v45 = vsel %vm864_vm8, %v855_v43, 0  ;;  %v857_v47 = vld [vmem:[%s853_s14 + $0xc] sm:$0xf]  ;;  %v961_v50 = vsel %vm864_vm8, %v856_v46, 0  ;;  %s2705_s20 = smov (!%p1829_p8), 8  }
 0x453   : > { %1911 = vmatpush3.bf16.xpose.msra.mxu0 %v869_v44  ;;  %1917 = vmatpush3.bf16.xpose.msra.mxu1 %v915_v45  ;;  %v1007_v51 = vsel %vm864_vm8, %v857_v47, 0  ;;  %v860_v28 = vld [vmem:[%s859_s21] sm:$0xf]  ;;  %v861_v31 = vld [vmem:[%s859_s21 + $0x4] sm:$0xf]  ;;  %s2706_s27 = smov (!%p1829_p8), 16  }
 0x454   : > { %1922 = vmatprep.subr.bf16.mxu0 %v2699_v41  ;;  %1928 = vmatprep.subr.bf16.mxu1 %v2699_v41  ;;  %v1151_v29 = vsel %vm1149_vm11, %v860_v28, 0  ;;  %v1197_v32 = vsel %vm1149_vm11, %v861_v31, 0  ;;  %v862_v33 = vld [vmem:[%s859_s21 + $0x8] sm:$0xf]  ;;  %v863_v35 = vld [vmem:[%s859_s21 + $0xc] sm:$0xf] }
 0x455   : > { %v1243_v34 = vsel %vm1149_vm11, %v862_v33, 0  ;;  %v1289_v36 = vsel %vm1149_vm11, %v863_v35, 0  ;;  %v1333_v31 = vld [vmem:[#allocation7 + $0x10] sm:$0xff]  ;;  %s2707_s1 = smov (!%p1829_p8), 24   ;;  %vm1439_vm0 = vcmask (!%p1829_p8), 257216   ;;  %vm1465_vm1 = vcmask (!%p1829_p8), 261120  }
 0x45a   : > { %1913 = vmatmul.mubr.msk.bf16.vlgmr.msra.gmra.mrb[0].mxu0 %vm864_vm8, %v847_v48  ;;  %1919 = vmatmul.mubr.msk.bf16.vlgmr.msra.gmra.mrb[0].mxu1 %vm864_vm8, %v848_v49 }
 0x45b   : > { %1923 = vmatpush3.bf16.xpose.msra.mxu0 %v961_v50  ;;  %1929 = vmatpush3.bf16.xpose.msra.mxu1 %v1007_v51 }
 0x45c   : > { %1924 = vmatprep.mubr.msk.bf16.mxu0 %vm2700_vm9, %v2699_v41  ;;  %1930 = vmatprep.mubr.msk.bf16.mxu1 %vm2700_vm9, %v2699_v41 }
 0x45d   : > { %1934 = vmatprep.subr.bf16.mxu0 %v2699_v41  ;;  %1940 = vmatprep.subr.bf16.mxu1 %v2699_v41 }
 0x462   : > { %1925 = vmatmul.mubr.msk.bf16.vlgmr.msra.gmra.mrb[4].mxu0 %vm864_vm8, %v849_v52  ;;  %1931 = vmatmul.mubr.msk.bf16.vlgmr.msra.gmra.mrb[4].mxu1 %vm864_vm8, %v850_v53 }
 0x463   : > { %1936 = vmatprep.mubr.msk.bf16.mxu0 %vm2700_vm9, %v2699_v41  ;;  %1942 = vmatprep.mubr.msk.bf16.mxu1 %vm2700_vm9, %v2699_v41 }
 0x464   : > { %1935 = vmatpush3.bf16.msra.mxu0 %v1151_v29  ;;  %1941 = vmatpush3.bf16.msra.mxu1 %v1197_v32 }
 0x465   : > { %1946 = vmatprep.subr.bf16.mxu0 %v2699_v41  ;;  %1952 = vmatprep.subr.bf16.mxu1 %v2699_v41 }
 0x52d   : > { %v3284_v54 = vpop.f32.mrb[0].mxu0  ;;  %v3286_v55 = vpop.f32.mrb[0].mxu1 }
 0x52e   : > { %v1914_v56 = vpop.f32.mrb[1].mxu0  ;;  %v1053_v57 = vsel %vm864_vm8, %v3284_v54, -inf  ;;  %v1920_v58 = vpop.f32.mrb[1].mxu1  ;;  %v1056_v63 = vsel %vm864_vm8, %v3286_v55, -inf }
 0x52f   : > { %1054 = vmax.xlane.f32.xlu0 %v1053_v57  ;;  %v908_v59 = vpop.f32.mrb[2].mxu0  ;;  %v954_v60 = vpop.f32.mrb[2].mxu1 }
 0x530   : > { %v1915_v61 = vpop.f32.mrb[3].mxu0  ;;  %v1921_v62 = vpop.f32.mrb[3].mxu1 }
 0x533   : > { %1057 = vmax.xlane.f32.xlu0 %v1056_v63 }
 0x535   : > { %v3292_v0 = vpop.f32.mrb[4].mxu0  ;;  %v3294_v1 = vpop.f32.mrb[4].mxu1 }
 0x536   : > { %v1926_v2 = vpop.f32.mrb[5].mxu0  ;;  %v1059_v3 = vsel %vm864_vm8, %v3292_v0, -inf  ;;  %v1932_v4 = vpop.f32.mrb[5].mxu1  ;;  %v1062_v9 = vsel %vm864_vm8, %v3294_v1, -inf }
 0x537   : > { %1060 = vmax.xlane.f32.xlu1 %v1059_v3  ;;  %v1000_v5 = vpop.f32.mrb[6].mxu0  ;;  %v1046_v6 = vpop.f32.mrb[6].mxu1  ;;  %v1113_v4 = vld [vmem:[#allocation6] sm:$0xff] }
 0x538   : > { %v1927_v7 = vpop.f32.mrb[7].mxu0  ;;  %v1933_v8 = vpop.f32.mrb[7].mxu1 }
 0x539   : > { %v1114_v7 = vld [vmem:[#allocation6 + $0x8] sm:$0xff] }
 0x53b   : > { %1063 = vmax.xlane.f32.xlu1 %v1062_v9 }
 0x5bc   : > { %v1055_v12 = vpop.xlane.xlu0 %1054 }
 0x5bd   : > { %v1065_v13 = vmax.f32 %v1049_v11, %v1055_v12 }
 0x5bf   : > { %v1069_v15 = vsub.f32 %v1049_v11, %v1065_v13  ;;  %1367 = vst.msk [vmem:[#allocation5] sm:$0xff] %vm1137_vm10, %v1065_v13  ;;  %1083 = vperm.xlu0 %2198, %v1065_v13   ;;  %v1115_v13 = vld [vmem:[#allocation6 + $0x10] sm:$0xff] }
 0x5c0   : > { %v1058_v16 = vpop.xlane.xlu0 %1057 }
 0x5c1   : > { %v1073_v17 = vmul.f32 1.442695, %v1069_v15  ;;  %v3304_v18 = vmax.f32 %v3300_v14, %v1058_v16  ;;  %v1116_v16 = vld [vmem:[#allocation6 + $0x18] sm:$0xff] }
 0x5c3   : > { %2200 = vpow2.f32 %v1073_v17  ;;  %v1070_v20 = vsub.f32 %v3300_v14, %v3304_v18  ;;  %1368 = vst.msk [vmem:[#allocation5 + $0x8] sm:$0xff] %vm1137_vm10, %v3304_v18  ;;  %1088 = vperm.xlu1 %2199, %v3304_v18  }
 0x5c4   : > { %v1061_v21 = vpop.xlane.xlu1 %1060 }
 0x5c5   : > { %v1067_v22 = vmax.f32 %v1051_v19, %v1061_v21  ;;  %v1075_v60 = vmul.f32 1.442695, %v1070_v20  ;;  %v1331_v21 = vld [vmem:[#allocation7] sm:$0xff] }
 0x5c7   : > { %v1071_v24 = vsub.f32 %v1051_v19, %v1067_v22  ;;  %1369 = vst.msk [vmem:[#allocation5 + $0x10] sm:$0xff] %vm1137_vm10, %v1067_v22  ;;  %1093 = vperm.xlu1 %2199, %v1067_v22  }
 0x5c8   : > { %v1064_v25 = vpop.xlane.xlu1 %1063 }
 0x5c9   : > { %v3315_v26 = vmax.f32 %v3311_v23, %v1064_v25 }
 0x5cb   : > { %v1072_v27 = vsub.f32 %v3311_v23, %v3315_v26  ;;  %1370 = vst.msk [vmem:[#allocation5 + $0x18] sm:$0xff] %vm1137_vm10, %v3315_v26  ;;  %1098 = vperm.xlu1 %2199, %v3315_v26   ;;  %v1332_v23 = vld [vmem:[#allocation7 + $0x8] sm:$0xff] }
 0x5cd   : > { %v3324_v30 = vpop.eup %2200 }
 0x5ce   : > { %v1117_v5 = vmul.f32 %v3324_v30, %v1113_v4 }
 0x5cf   : > { %1337 = vperm.xlu1 %2199, %v3324_v30  }
 0x63e   : > { %v1084_v37 = vpop.permute.xlu0 %1083 }
 0x63f   : > { %v1101_v38 = vsub.f32 %v3284_v54, %v1084_v37  ;;  %v1077_v54 = vmul.f32 1.442695, %v1071_v24 }
 0x641   : > { %v1105_v39 = vmul.f32 1.442695, %v1101_v38  ;;  %v1334_v38 = vld [vmem:[#allocation7 + $0x18] sm:$0xff] }
 0x642   : > { %v1089_v40 = vpop.permute.xlu1 %1088 }
 0x643   : > { %2202 = vpow2.f32 %v1105_v39  ;;  %v1102_v42 = vsub.f32 %v3286_v55, %v1089_v40 }
 0x645   : > { %v1107_v43 = vmul.f32 1.442695, %v1102_v42 }
 0x646   : > { %v1094_v44 = vpop.permute.xlu1 %1093 }
 0x647   : > { %2204 = vpow2.f32 %v1107_v43  ;;  %v1103_v45 = vsub.f32 %v3292_v0, %v1094_v44 }
 0x649   : > { %v1109_v46 = vmul.f32 1.442695, %v1103_v45 }
 0x64a   : > { %v1099_v47 = vpop.permute.xlu1 %1098 }
 0x64b   : > { %2206 = vpow2.f32 %v1109_v46  ;;  %v1104_v48 = vsub.f32 %v3294_v1, %v1099_v47  ;;  %v1079_v1 = vmul.f32 1.442695, %v1072_v27 }
 0x64d   : > { %v2203_v49 = vpop.eup %2202  ;;  %v1111_v50 = vmul.f32 1.442695, %v1104_v48 }
 0x64e   : > { %v1121_v51 = vsel %vm864_vm8, %v2203_v49, 0.0  ;;  %v1142_v52 = vpack.c.bf16 %v2203_v49, %v2203_v49  ;;  %v1338_v3 = vpop.permute.xlu1 %1337 }
 0x64f   : > { %2208 = vpow2.f32 %v1111_v50  ;;  %1122 = vadd.xlane.f32.xlu1 %v1121_v51  ;;  %v1355_v22 = vmul.f32 %v1338_v3, %v1331_v21 }
 0x650   : > { %1937 = vmatmul.mubr.msk.bf16.vlgmr.msra.gmra.mrb[8].mxu0 %vm864_vm8, %v1142_v52  ;;  %2210 = vpow2.f32 %v1077_v54 }
 0x651   : > { %v2205_v53 = vpop.eup %2204  ;;  %1947 = vmatpush3.bf16.msra.mxu0 %v1243_v34  ;;  %1948 = vmatprep.mubr.msk.bf16.mxu0 %vm2700_vm9, %v2699_v41  ;;  %2212 = vpow2.f32 %v1075_v60 }
 0x652   : > { %v1124_v55 = vsel %vm864_vm8, %v2205_v53, 0.0  ;;  %v1143_v56 = vpack.c.bf16 %v2205_v53, %v2205_v53  ;;  %2214 = vpow2.f32 %v1079_v1 }
 0x653   : > { %1125 = vadd.xlane.f32.xlu0 %v1124_v55  ;;  %v2702_v55 = vmov (!%p1829_p8), 0  }
 0x654   : > { %1943 = vmatmul.mubr.msk.bf16.vlgmr.msra.gmra.mrb[8].mxu1 %vm864_vm8, %v1143_v56 }
 0x655   : > { %v2207_v57 = vpop.eup %2206  ;;  %1953 = vmatpush3.bf16.msra.mxu1 %v1289_v36  ;;  %1954 = vmatprep.mubr.msk.bf16.mxu1 %vm2700_vm9, %v2699_v41 }
 0x656   : > { %v1144_v58 = vpack.c.bf16 %v2207_v57, %v2207_v57  ;;  %v1127_v0 = vsel %vm864_vm8, %v2207_v57, 0.0 }
 0x658   : > { %1949 = vmatmul.mubr.msk.bf16.vlgmr.msra.gmra.mrb[12].mxu0 %vm864_vm8, %v1144_v58 }
 0x659   : > { %v2209_v59 = vpop.eup %2208 }
 0x65a   : > { %v1145_v61 = vpack.c.bf16 %v2209_v59, %v2209_v59  ;;  %v2211_v62 = vpop.eup %2210  ;;  %v1130_v41 = vsel %vm864_vm8, %v2209_v59, 0.0 }
 0x65b   : > { %v2213_v63 = vpop.eup %2212  ;;  %v1119_v14 = vmul.f32 %v2211_v62, %v1115_v13 }
 0x65c   : > { %1955 = vmatmul.mubr.msk.bf16.vlgmr.msra.gmra.mrb[12].mxu1 %vm864_vm8, %v1145_v61  ;;  %v2215_v2 = vpop.eup %2214  ;;  %v1118_v9 = vmul.f32 %v2213_v63, %v1114_v7  ;;  %v2218_v61 = vld [vmem:[#allocation23] sm:$0xff] (!%p1829_p8)  }
 0x65d   : > { %v1120_v18 = vmul.f32 %v2215_v2, %v1116_v16 }
 0x660   : > { %1347 = vperm.xlu1 %2199, %v2211_v62   ;;  %v2703_v62 = vmov (!%p1829_p8), 0.0  }
 0x661   : > { %1958 = vmatprep.subr.bf16.mxu0 (!%p1829_p8), %v2703_v62  ;;  %1962 = vmatprep.mubr.msk.bf16.mxu0 (!%p1829_p8), %vm2704_vm12, %v2703_v62 }
 0x662   : > { %1959 = vmatpush3.bf16.msra.mxu0 (!%p1829_p8), %v2218_v61 }
 0x663   : > { %1960 = vmatprep.subr.bf16.mxu0 (!%p1829_p8), %v2703_v62 }
 0x669   : > { %1342 = vperm.xlu0 %2198, %v2213_v63  }
 0x66d   : > { %2216 = vset.pattern.permute.xlu0 (!%p1829_p8), %v2702_v55 }
 0x684   : > { %1128 = vadd.xlane.f32.xlu1 %v1127_v0  ;;  %v2219_v0 = vld [vmem:[#allocation23 + $0x8] sm:$0xff] (!%p1829_p8)  }
 0x685   : > { %1961 = vmatpush3.bf16.msra.mxu0 (!%p1829_p8), %v2219_v0 }
 0x688   : > { %1131 = vadd.xlane.f32.xlu1 %v1130_v41 }
 0x699   : > { %1352 = vperm.xlu1 %2199, %v2215_v2  }
 0x69d   : > { %2217 = vset.pattern.permute.xlu1 (!%p1829_p8), %v2702_v55 }
 0x6dc   : > { %v1123_v6 = vpop.xlane.xlu1 %1122 }
 0x6dd   : > { %v1133_v8 = vadd.f32 %v1123_v6, %v1117_v5 }
 0x6df   : > { %1138 = vst.msk [vmem:[#allocation6] sm:$0xff] %vm1137_vm10, %v1133_v8 }
 0x6e0   : > { %v1126_v10 = vpop.xlane.xlu0 %1125  ;;  %v1348_v12 = vpop.permute.xlu1 %1347 }
 0x6e1   : > { %v1134_v11 = vadd.f32 %v1126_v10, %v1118_v9  ;;  %v1357_v36 = vmul.f32 %v1348_v12, %v1333_v31 }
 0x6e3   : > { %1139 = vst.msk [vmem:[#allocation6 + $0x8] sm:$0xff] %vm1137_vm10, %v1134_v11 }
 0x6e6   : > { %v1375_v56 = vld [vmem:[#allocation6] sm:$0xff] (!%p1829_p8) }
 0x6e8   : > { %v1343_v24 = vpop.permute.xlu0 %1342 }
 0x6e9   : > { %v1356_v29 = vmul.f32 %v1343_v24, %v1332_v23 }
 0x6ea   : > { %v1376_v52 = vld [vmem:[#allocation6 + $0x8] sm:$0xff] (!%p1829_p8) }
 0x6eb   : > { %2220 = vrcp.f32 (!%p1829_p8), %v1376_v52 }
 0x6f5   : > { %v2221_v57 = vpop.eup (!%p1829_p8), %2220 }
 0x6f6   : > { %1394 = vperm.xlu0 (!%p1829_p8), %2216, %v2221_v57  }
 0x711   : > { %v1129_v15 = vpop.xlane.xlu1 %1128 }
 0x712   : > { %v1135_v17 = vadd.f32 %v1129_v15, %v1119_v14 }
 0x714   : > { %1140 = vst.msk [vmem:[#allocation6 + $0x10] sm:$0xff] %vm1137_vm10, %v1135_v17 }
 0x715   : > { %v1132_v19 = vpop.xlane.xlu1 %1131 }
 0x716   : > { %v1136_v20 = vadd.f32 %v1132_v19, %v1120_v18  ;;  %v1833_v19 = vld [vmem:[#allocation24] ss:$0 sm:$0xff] (!%p1829_p8) }
 0x718   : > { %1141 = vst.msk [vmem:[#allocation6 + $0x18] sm:$0xff] %vm1137_vm10, %v1136_v20 }
 0x719   : > { %v1353_v39 = vpop.permute.xlu1 %1352 }
 0x71a   : > { %v1358_v45 = vmul.f32 %v1353_v39, %v1334_v38 }
 0x71b   : > { %v1377_v54 = vld [vmem:[#allocation6 + $0x10] sm:$0xff] (!%p1829_p8) }
 0x71f   : > { %v1378_v53 = vld [vmem:[#allocation6 + $0x18] sm:$0xff] (!%p1829_p8) }
 0x720   : > { %2222 = vrcp.f32 (!%p1829_p8), %v1378_v53 }
 0x721   : > { %2224 = vrcp.f32 (!%p1829_p8), %v1377_v54 }
 0x722   : > { %2226 = vrcp.f32 (!%p1829_p8), %v1375_v56 }
 0x723   : > { %v1187_v25 = vpop.f32.mrb[8].mxu0 }
 0x724   : > { %v1359_v26 = vadd.f32 %v1355_v22, %v1187_v25  ;;  %v1938_v27 = vpop.f32.mrb[9].mxu0 }
 0x725   : > { %v1190_v28 = vpop.f32.mrb[10].mxu0 }
 0x726   : > { %1363 = vst.msk [vmem:[#allocation7] sm:$0xff] %vm864_vm8, %v1359_v26  ;;  %v1939_v30 = vpop.f32.mrb[11].mxu0 }
 0x727   : > { %v1233_v32 = vpop.f32.mrb[8].mxu1 }
 0x728   : > { %v1360_v33 = vadd.f32 %v1356_v29, %v1233_v32  ;;  %v1944_v34 = vpop.f32.mrb[9].mxu1 }
 0x729   : > { %v1236_v35 = vpop.f32.mrb[10].mxu1 }
 0x72a   : > { %1364 = vst.msk [vmem:[#allocation7 + $0x8] sm:$0xff] %vm864_vm8, %v1360_v33  ;;  %v1945_v37 = vpop.f32.mrb[11].mxu1  ;;  %v2223_v58 = vpop.eup (!%p1829_p8), %2222 }
 0x72b   : > { %v1279_v40 = vpop.f32.mrb[12].mxu0  ;;  %v2225_v59 = vpop.eup (!%p1829_p8), %2224  ;;  %1404 = vperm.xlu1 (!%p1829_p8), %2217, %v2223_v58  }
 0x72c   : > { %v1361_v42 = vadd.f32 %v1357_v36, %v1279_v40  ;;  %v1950_v43 = vpop.f32.mrb[13].mxu0  ;;  %1374 = sbr.rel (%p1829_p8) target bundleno = 2307 (0x903), region = 112  ;;  %v2227_v60 = vpop.eup (!%p1829_p8), %2226  ;;  %1399 = vperm.xlu0 (!%p1829_p8), %2216, %v2225_v59  }
 0x72d   : > { %v1282_v44 = vpop.f32.mrb[14].mxu0  ;;  %v1383_v7 = vld [vmem:[#allocation7] sm:$0xff] (!%p1829_p8) }
 0x72e   : > { %1365 = vst.msk [vmem:[#allocation7 + $0x10] sm:$0xff] %vm864_vm8, %v1361_v42  ;;  %v1951_v46 = vpop.f32.mrb[15].mxu0 }
 0x72f   : > { %v1325_v47 = vpop.f32.mrb[12].mxu1  ;;  %1389 = vperm.xlu1 (!%p1829_p8), %2217, %v2227_v60  }
 0x730   : > { %v1362_v48 = vadd.f32 %v1358_v45, %v1325_v47  ;;  %v1956_v49 = vpop.f32.mrb[13].mxu1 }
 0x731   : > { %v1328_v50 = vpop.f32.mrb[14].mxu1  ;;  %v1384_v63 = vld [vmem:[#allocation7 + $0x8] sm:$0xff] (!%p1829_p8) }
 0x732   : > { %1366 = vst.msk [vmem:[#allocation7 + $0x18] sm:$0xff] %vm864_vm8, %v1362_v48  ;;  %v1957_v51 = vpop.f32.mrb[15].mxu1 }
 0x735   : > { %v1385_v5 = vld [vmem:[#allocation7 + $0x10] sm:$0xff] }
 0x739   : > { %v1386_v41 = vld [vmem:[#allocation7 + $0x18] sm:$0xff] }
 0x775   : > { %v1395_v1 = vpop.permute.xlu0 %1394 }
 0x776   : > { %v1408_v2 = vmul.f32 %v1395_v1, %v1384_v63 }
 0x778   : > { %v1855_v6 = vpack.c.bf16 %v1408_v2, %v1408_v2 }
 0x77a   : > { %1420 = vrot.lane.b32.xlu0 %v1855_v6, %s2705_s20 }
 0x7aa   : > { %v1405_v3 = vpop.permute.xlu1 %1404 }
 0x7ab   : > { %v1410_v4 = vmul.f32 %v1405_v3, %v1386_v41  ;;  %v1400_v8 = vpop.permute.xlu0 %1399 }
 0x7ac   : > { %v1409_v10 = vmul.f32 %v1400_v8, %v1385_v5 }
 0x7ad   : > { %v1857_v9 = vpack.c.bf16 %v1410_v4, %v1410_v4 }
 0x7ae   : > { %v1390_v11 = vpop.permute.xlu1 %1389  ;;  %v1856_v13 = vpack.c.bf16 %v1409_v10, %v1409_v10 }
 0x7af   : > { %v1407_v12 = vmul.f32 %v1390_v11, %v1383_v7  ;;  %1436 = vrot.lane.b32.xlu0 %v1857_v9, %s2707_s1 }
 0x7b0   : > { %1428 = vrot.lane.b32.xlu1 %v1856_v13, %s2706_s27 }
 0x7b1   : > { %v1411_v14 = vpack.c.bf16 %v1407_v12, %v1407_v12 }
 0x7b3   : > { %1416 = vst.msk [vmem:[#allocation8] sm:$0xf] %vm1415_vm13, %v1411_v14 }
 0x7ec   : > { %v1421_v15 = vpop.permute.xlu0 %1420 }
 0x7ed   : > { %1424 = vst.msk [vmem:[#allocation8] sm:$0xf] %vm1423_vm14, %v1421_v15 }
 0x821   : > { %v1437_v17 = vpop.permute.xlu0 %1436 }
 0x822   : > { %v1429_v16 = vpop.permute.xlu1 %1428 }
 0x823   : > { %1432 = vst.msk [vmem:[#allocation8] sm:$0xf] %vm1431_vm15, %v1429_v16 }
 0x824   : > { %1440 = vst.msk [vmem:[#allocation8] sm:$0xf] %vm1439_vm0, %v1437_v17 }
 0x82b   : > { %v1441_v18 = vld [vmem:[#allocation8] sm:$0xf] }
 0x82c   : > { %1963 = vmatmul.mubr.msk.bf16.vlgmr.msra.gmra.mrb[0].mxu0 %vm1465_vm1, %v1441_v18 }
 0x8ff   : > { %v1503_v20 = vpop.f32.mrb[0].mxu0 }
 0x900   : > { %v1504_v21 = vadd.f32 %v1833_v19, %v1503_v20  ;;  %v1964_v22 = vpop.f32.mrb[1].mxu0 }
 0x901   : > { %v1506_v23 = vpop.f32.mrb[2].mxu0 }
 0x902   : > { %1509 = vst.msk [vmem:[%s3239_s29] sm:$0xff] %vm1465_vm1, %v1504_v21  ;;  %v1965_v24 = vpop.f32.mrb[3].mxu0 }
 0x903 PF: > { %s3537_s10 = sld [smem:[#allocation40_spill]]  ;;  %s3538_s7 = sld [smem:[#allocation39_spill]] }
 0x904   : > { %s1526_s5 = sshll.u32 %s3239_s29, 4  ;;  %s3539_s8 = sld [smem:[#allocation55_spill]]  ;;  %s3365_s5 = int_to_ptr.vmem [resolvable:$true] %s1526_s5 }
 0x905   : > { %s1511_s14 = scalar_lea.sflag [#allocation11], %s3199_s15  ;;  %s2512_s21 = scalar_lea.vmem %s3365_s5, 128 }
 0x906   : > { %p2513_p7 = scmp.ne.s32.totalorder %s3365_s5, %s2512_s21  ;;  %p3540_p11 = scmp.ne.s32.totalorder %s3504_s12, 0 }
 0x907   : > { %s2708_s20 = smov [#allocation26]  }
 0x908   : > { %p2514_p0 = pnand %p2513_p7, %p3540_p11  ;;  %s2516_s27 = sshll.u32 %s2708_s20, 4  ;;  %s2517_s27 = int_to_ptr.vmem [resolvable:$false] %s2516_s27 }
 0x909   : > { %s1838_s19 = sshll.u32 %s3537_s10, 1  ;;  %s2518_s29 = scalar_lea.vmem %s2517_s27, 256 }
 0x90a   : > { %s1522_s11 = sadd.s32 %s3538_s7, %s1838_s19  ;;  %p2515_p12 = pneg %p2514_p0 }
 0x90b   : > { %s1839_s4 = sshll.u32 %s1522_s11, 7  ;;  %p2519_p3 = scmp.lt.s32.totalorder %s3365_s5, %s2517_s27 }
 0x90c   : > { %s1524_s9 = scalar_lea.hbm %s3539_s8, %s1839_s4  ;;  %p2520_p13 = scmp.lt.s32.totalorder %s2518_s29, %s2512_s21 }
 0x90e   : > { %p2521_p4 = por %p2520_p13, %p2519_p3 }
 0x910   : > { %p2522_p5 = pnand %p2521_p4, %p2515_p12 }
 0x912   : > { %2525 = shalt.err (!%p2522_p5)
}
 0x913   : > { %s2526_s1 = scalar_lea.hbm %s1524_s9, 128  ;;  %s2530_s7 = scalar_lea.hbm %s3539_s8, 512 }
 0x914   : > { %p2527_p2 = scmp.ne.s32.totalorder %s1524_s9, %s2526_s1  ;;  %p2531_p9 = scmp.lt.u32.totalorder %s1524_s9, %s3539_s8 }
 0x915   : > { %p2532_p10 = scmp.lt.u32.totalorder %s2530_s7, %s2526_s1  ;;  %p2534_p7 = scmp.lt.u32.totalorder %s2526_s1, %s1524_s9 }
 0x916   : > { %p2528_p6 = pnand %p2527_p2, %p3540_p11 }
 0x917   : > { %p2533_p8 = por %p2532_p10, %p2531_p9 }
 0x918   : > { %p2529_p1 = pneg %p2528_p6 }
 0x919   : > { %p2535_p0 = por %p2534_p7, %p2533_p8 }
 0x91b   : > { %p2536_p12 = pnand %p2535_p0, %p2529_p1 }
 0x91d   : > { %2539 = shalt.err (!%p2536_p12)
}
 0x91e   : > { %2002 = dma.vmem_to_hbm [thread:$0]  (%p3540_p11), %s3365_s5, 128, %s1524_s9, %s1511_s14  }
 0x91f PF: > { %p2057_p3 = scmp.ge.s32.totalorder %s2674_s25, 2  ;;  %s1538_s4 = sand.u32 1, %s2638_s16  }
 0x920   : > { %p3541_p13 = scmp.ne.s32.totalorder %s3505_s0, 0  ;;  %s1539_s26 = scalar_lea.sflag [#allocation11], %s1538_s4 }
 0x922   : > { %p2037_p4 = pnand %p2057_p3, %p3541_p13 }
 0x924   : > { %2621 = dma.done.wait (!%p2037_p4), %s1539_s26, 128  }
 0x925   : > { %2623 = vsyncadd (!%p2037_p4), %s1539_s26, 4294967168  ;;  %s33_s25 = sadd.s32 1, %s2674_s25   ;;  %s3543_s12 = sld [smem:[#allocation36_spill]] }
 0x926   : > { %p3392_p5 = scmp.ge.s32.totalorder %s33_s25, 10   ;;  %s3544_s14 = sld [smem:[#allocation37_spill]] }
 0x927   : > { %s3545_s5 = smov %s3090_s13  ;;  %s3546_s0 = sld [smem:[#allocation43_spill]] }
 0x928   : > { %s3547_s9 = sld [smem:[#allocation44_spill]]  ;;  %s3549_s15 = smov %s3143_s28 }
 0x929   : > { %s3550_s16 = smov %s2642_s17  ;;  %s3551_s17 = smov %s2646_s18 }
 0x92a   : > { %s3552_s18 = smov %s3545_s5  ;;  %s3553_s19 = smov %s2662_s22 }
 0x92b   : > { %s3548_s13 = smov %s3543_s12  ;;  %s3554_s20 = smov %s2666_s23 }
 0x92c   : > { %s3555_s21 = smov %s2670_s24  ;;  %s3556_s22 = smov %s3560_s30 }
 0x92d   : > { %s3557_s23 = smov %s3546_s0  ;;  %32 = sbr.rel (!%p3392_p5) target bundleno = 28 (0x1c), region = 175 }
 0x92e   : > { %s3558_s24 = smov %s3547_s9 }
 0x934   :  { %1544 = vsyncpa [#allocation10], 1 }
 0x935   :  { %1546 = vsyncpa [#allocation10 + $0x1], 1 }
 0x936   :  { %1547 = vsyncpa [#allocation13], 1 }
 0x937   :  { %1549 = vsyncpa [#allocation13 + $0x1], 1 }
 0x938   :  { %1550 = vsyncpa [#allocation16], 1 }
 0x939   :  { %1551 = vsyncpa [#allocation19], 1 }
 0x93a   :  { %1552 = vsyncpa [#allocation22], 1 }
 0x93b   :  { %1553 = vsyncpa [#allocation25], 1 }
 0x93c   :  { %1554 = vsyncpa [#allocation11], 1 }
 0x93d   :  { %1556 = vsyncpa [#allocation11 + $0x1], 1 }

</bundles_post_ra>
